<compile_context>
chip_gen: v5e
topology: v5e:2x2
jax: 0.10.0
libtpu: 0.0.40
codegen_flags: <defaults>
</compile_context>

<pallas_src>
import functools

import jax
import jax.numpy as jnp
from jax.experimental import pallas as pl
from jax.experimental.pallas import tpu as pltpu

NUM_CLASSES = 10
BN_EPS = 1e-5
TILE_M = 512


def _round_up(x, m):
    return (x + m - 1) // m * m


# ----------------------------------------------------------------------------- kernel
def _fused_matmul_bias_act_kernel(x_ref, w_ref, b_ref, o_ref, *, act):
    """o = act(x @ w + b) — bf16 operands, f32 MXU accumulation, f32 epilogue."""
    y = jnp.dot(x_ref[...], w_ref[...], preferred_element_type=jnp.float32)
    y = y + b_ref[...]                        # per-output-channel shift (BN folded)
    if act == "leaky":
        y = jnp.where(y > 0, y, 0.2 * y)      # LeakyReLU(0.2)
    elif act == "sigmoid":
        y = 0.5 * (jnp.tanh(0.5 * y) + 1.0)   # numerically stable sigmoid (EUP tanh)
    o_ref[...] = y.astype(o_ref.dtype)


def fused_matmul_bias_act(patches, w, shift, act, out_dtype):
    """patches [M,K] @ w [K,N] + shift [1,N], fused activation; M-tiled parallel grid."""
    M, K = patches.shape
    _, N = w.shape

    # Pad M so row tiles respect the sublane rule and divide the grid evenly.
    Mp = _round_up(M, 8)
    tile_m = min(TILE_M, Mp)
    Mp = _round_up(Mp, tile_m)
    if Mp != M:
        patches = jnp.pad(patches, ((0, Mp - M), (0, 0)))

    kernel = functools.partial(_fused_matmul_bias_act_kernel, act=act)
    out = pl.pallas_call(
        kernel,
        out_shape=jax.ShapeDtypeStruct((Mp, N), out_dtype),
        grid=(Mp // tile_m,),
        in_specs=[
            pl.BlockSpec((tile_m, K), lambda i: (i, 0)),   # row tile of patches
            pl.BlockSpec((K, N), lambda i: (0, 0)),        # full weight, resident
            pl.BlockSpec((1, N), lambda i: (0, 0)),        # per-channel shift
        ],
        out_specs=pl.BlockSpec((tile_m, N), lambda i: (i, 0)),
        compiler_params=pltpu.CompilerParams(
            dimension_semantics=("parallel",),
            vmem_limit_bytes=32 * 1024 * 1024,             # safe on v5e/v6e/v7x
        ),
    )(patches, w, shift)
    return out[:M]


# ------------------------------------------------------------------------------- glue
def im2col_nhwc(x, kh, kw, stride, pad):
    """x: [B,H,W,C] -> ([B*OH*OW, kh*kw*C], B, OH, OW); feature order (ki, kj, c)."""
    B, H, W, C = x.shape
    xp = jnp.pad(x, ((0, 0), (pad, pad), (pad, pad), (0, 0)))
    OH = (H + 2 * pad - kh) // stride + 1
    OW = (W + 2 * pad - kw) // stride + 1
    cols = []
    for i in range(kh):
        for j in range(kw):
            cols.append(xp[:, i:i + stride * OH:stride, j:j + stride * OW:stride, :])
    p = jnp.stack(cols, axis=3)                       # [B, OH, OW, kh*kw, C]  (bf16)
    return p.reshape(B * OH * OW, kh * kw * C), B, OH, OW


def fold_conv_bn(w, scale, shift):
    """Torch weight (Cout,Cin,kh,kw) + BN(eval) -> bf16 [kh*kw*Cin, Cout] + f32 shift."""
    Cout, Cin, kh, kw = w.shape
    wm = jnp.transpose(w, (2, 3, 1, 0)).reshape(kh * kw * Cin, Cout)   # rows = (ki,kj,c)
    wm = wm * scale.reshape(1, Cout)                                   # fold BN scale
    return wm.astype(jnp.bfloat16), shift.reshape(1, Cout).astype(jnp.float32)


def conv_bn_act_nhwc(x, wm, shift, kh, kw, stride, pad, act, out_dtype=jnp.bfloat16):
    """Conv2d(bias=False) + BN(eval, folded) + activation; NHWC in / NHWC out."""
    patches, B, OH, OW = im2col_nhwc(x, kh, kw, stride, pad)
    out = fused_matmul_bias_act(patches, wm, shift, act, out_dtype)
    return out.reshape(B, OH, OW, wm.shape[1])


def bn_affine(gamma, beta, mean, var):
    scale = gamma / jnp.sqrt(var + BN_EPS)
    shift = beta - mean * scale
    return scale, shift


# ------------------------------------------------------------------------ parameters
def init_params(key, nc, ndf):
    ks = list(jax.random.split(key, 32))
    k = iter(ks)

    def conv_w(cout, cin):
        return 0.02 * jax.random.normal(next(k), (cout, cin, 4, 4), jnp.float32)

    def bn_params(c):
        gamma = 1.0 + 0.02 * jax.random.normal(next(k), (c,), jnp.float32)
        beta = 0.02 * jax.random.normal(next(k), (c,), jnp.float32)
        mean = 0.1 * jax.random.normal(next(k), (c,), jnp.float32)
        var = 0.5 + jax.random.uniform(next(k), (c,), jnp.float32)
        return gamma, beta, mean, var

    return {
        "w_img": conv_w(ndf, nc),            "bn_img": bn_params(ndf),
        "w_lbl": conv_w(ndf, NUM_CLASSES),   "bn_lbl": bn_params(ndf),
        "w1": conv_w(ndf * 4, ndf * 2),      "bn1": bn_params(ndf * 4),
        "w2": conv_w(ndf * 8, ndf * 4),      "bn2": bn_params(ndf * 8),
        "w3": conv_w(1, ndf * 8),
    }


# --------------------------------------------------------------------------- forward
def discriminator_forward(params, image, label):
    ndf, nc = params["w_img"].shape[0], params["w_img"].shape[1]

    # Fold eval-mode BatchNorm into each conv.
    si, bi = bn_affine(*params["bn_img"])
    sl, bl = bn_affine(*params["bn_lbl"])
    s1, b1 = bn_affine(*params["bn1"])
    s2, b2 = bn_affine(*params["bn2"])

    # Fuse the two parallel first-layer convs into one block-structured conv:
    # input channels [0:nc] (image) -> output channels [0:ndf];
    # input channels [nc:nc+10] (label) -> output channels [ndf:2ndf];
    # this reproduces torch.cat((image_branch, label_branch), dim=1) exactly.
    w_comb = jnp.zeros((2 * ndf, nc + NUM_CLASSES, 4, 4), jnp.float32)
    w_comb = w_comb.at[:ndf, :nc].set(params["w_img"])
    w_comb = w_comb.at[ndf:, nc:].set(params["w_lbl"])
    s0 = jnp.concatenate([si, sl])
    b0 = jnp.concatenate([bi, bl])

    wm0, sh0 = fold_conv_bn(w_comb, s0, b0)
    wm1, sh1 = fold_conv_bn(params["w1"], s1, b1)
    wm2, sh2 = fold_conv_bn(params["w2"], s2, b2)
    wm3, sh3 = fold_conv_bn(params["w3"], jnp.ones((1,), jnp.float32),
                            jnp.zeros((1,), jnp.float32))   # final conv: no BN

    # NCHW -> NHWC once at the boundary; bf16 activations end-to-end.
    x = jnp.concatenate([image, label], axis=1)                   # [B, nc+10, H, W]
    x = jnp.transpose(x, (0, 2, 3, 1)).astype(jnp.bfloat16)       # [B, H, W, nc+10]

    x = conv_bn_act_nhwc(x, wm0, sh0, 4, 4, 2, 1, "leaky")        # fused image||label
    x = conv_bn_act_nhwc(x, wm1, sh1, 4, 4, 2, 1, "leaky")
    x = conv_bn_act_nhwc(x, wm2, sh2, 4, 4, 2, 1, "leaky")
    x = conv_bn_act_nhwc(x, wm3, sh3, 4, 4, 1, 0, "sigmoid", out_dtype=jnp.float32)

    B = x.shape[0]
    return x.reshape(B, 1, 1, 1)                                  # NCHW (1x1 spatial)


# ------------------------------------------------------------------------------ main
if __name__ == "__main__":
    nc, ndf = 3, 8
    B, H, W = 2, 32, 32   # 32x32 input -> 16 -> 8 -> 4 -> 1 (matches the 4x4 final conv)

    key = jax.random.PRNGKey(0)
    k_param, k_img, k_lbl = jax.random.split(key, 3)

    params = init_params(k_param, nc, ndf)
    image = jax.random.normal(k_img, (B, nc, H, W), jnp.float32)
    label = jax.random.normal(k_lbl, (B, NUM_CLASSES, H, W), jnp.float32)

    fwd = jax.jit(discriminator_forward)
    out = fwd(params, image, label)
    out = jax.block_until_ready(out)

    assert out.shape == (B, 1, 1, 1)
    assert bool(jnp.all(jnp.isfinite(out)))
    assert bool(jnp.all((out >= 0.0) & (out <= 1.0)))   # sigmoid range
    print("KERNEL_OK")
</pallas_src>

<mosaic_0001>
module attributes {stable_mosaic.version = 11 : i64} {
  func.func @_fused_matmul_bias_act_kernel(%arg0: i32, %arg1: memref<512x208xbf16, #tpu.memory_space<vmem>>, %arg2: memref<208x16xbf16, #tpu.memory_space<vmem>>, %arg3: memref<1x16xf32, #tpu.memory_space<vmem>>, %arg4: memref<512x16xbf16, #tpu.memory_space<vmem>>) attributes {dimension_semantics = [#tpu.dimension_semantics<parallel>], iteration_bounds = array<i64: 1>, scalar_prefetch = 0 : i64, scratch_operands = 0 : i64, tpu.core_type = #tpu.core_type<tc>, window_params = [{transform_indices = @transform_0, window_bounds = array<i64: 512, 208>}, {pipeline_mode = #tpu.pipeline_mode<synchronous>, transform_indices = @transform_1, window_bounds = array<i64: 208, 16>}, {pipeline_mode = #tpu.pipeline_mode<synchronous>, transform_indices = @transform_2, window_bounds = array<i64: 1, 16>}, {transform_indices = @transform_3, window_bounds = array<i64: 512, 16>}]} {
    %c0 = arith.constant 0 : index
    %c0_0 = arith.constant 0 : index
    %0 = vector.load %arg1[%c0, %c0_0] : memref<512x208xbf16, #tpu.memory_space<vmem>>, vector<512x208xbf16>
    %c0_1 = arith.constant 0 : index
    %c0_2 = arith.constant 0 : index
    %1 = vector.load %arg2[%c0_1, %c0_2] : memref<208x16xbf16, #tpu.memory_space<vmem>>, vector<208x16xbf16>
    %cst = arith.constant dense<0.000000e+00> : vector<512x16xf32>
    %2 = tpu.matmul %0, %1, %cst {dimension_numbers = #tpu.dot_dimension_numbers<[1], [0], [0], [1], [0, 0, 1, 1], [], []>} : vector<512x208xbf16>, vector<208x16xbf16>, vector<512x16xf32> -> vector<512x16xf32>
    %c0_3 = arith.constant 0 : index
    %c0_4 = arith.constant 0 : index
    %3 = vector.load %arg3[%c0_3, %c0_4] : memref<1x16xf32, #tpu.memory_space<vmem>>, vector<1x16xf32>
    %4 = vector.broadcast %3 : vector<1x16xf32> to vector<512x16xf32>
    %5 = arith.addf %2, %4 : vector<512x16xf32>
    %cst_5 = arith.constant 0.000000e+00 : f32
    %6 = vector.broadcast %cst_5 : f32 to vector<512x16xf32>
    %7 = arith.cmpf ogt, %5, %6 : vector<512x16xf32>
    %cst_6 = arith.constant 2.000000e-01 : f32
    %8 = vector.broadcast %cst_6 : f32 to vector<512x16xf32>
    %9 = arith.mulf %8, %5 : vector<512x16xf32>
    %10 = arith.select %7, %5, %9 : vector<512x16xi1>, vector<512x16xf32>
    %11 = arith.truncf %10 : vector<512x16xf32> to vector<512x16xbf16>
    %c0_7 = arith.constant 0 : index
    %c0_8 = arith.constant 0 : index
    %12 = vector.load %arg4[%c0_7, %c0_8] : memref<512x16xbf16, #tpu.memory_space<vmem>>, vector<512x16xbf16>
    tpu.vector_store %arg4[%c0_7, %c0_8], %11 {strides = array<i32>} : memref<512x16xbf16, #tpu.memory_space<vmem>>, vector<512x16xbf16>,
    return
  }
  func.func @transform_0(%arg0: i32) -> (i32, i32) {
    %c0_i32 = arith.constant 0 : i32
    %c0_i32_0 = arith.constant 0 : i32
    return %arg0, %c0_i32 : i32, i32
  }
  func.func @transform_1(%arg0: i32) -> (i32, i32) {
    %c0_i32 = arith.constant 0 : i32
    %c0_i32_0 = arith.constant 0 : i32
    %c0_i32_1 = arith.constant 0 : i32
    return %c0_i32, %c0_i32_0 : i32, i32
  }
  func.func @transform_2(%arg0: i32) -> (i32, i32) {
    %c0_i32 = arith.constant 0 : i32
    %c0_i32_0 = arith.constant 0 : i32
    %c0_i32_1 = arith.constant 0 : i32
    return %c0_i32, %c0_i32_0 : i32, i32
  }
  func.func @transform_3(%arg0: i32) -> (i32, i32) {
    %c0_i32 = arith.constant 0 : i32
    %c0_i32_0 = arith.constant 0 : i32
    return %arg0, %c0_i32 : i32, i32
  }
}

module attributes {stable_mosaic.version = 11 : i64} {
  func.func @_fused_matmul_bias_act_kernel(%arg0: i32, %arg1: memref<128x256xbf16, #tpu.memory_space<vmem>>, %arg2: memref<256x32xbf16, #tpu.memory_space<vmem>>, %arg3: memref<1x32xf32, #tpu.memory_space<vmem>>, %arg4: memref<128x32xbf16, #tpu.memory_space<vmem>>) attributes {dimension_semantics = [#tpu.dimension_semantics<parallel>], iteration_bounds = array<i64: 1>, scalar_prefetch = 0 : i64, scratch_operands = 0 : i64, tpu.core_type = #tpu.core_type<tc>, window_params = [{transform_indices = @transform_0, window_bounds = array<i64: 128, 256>}, {pipeline_mode = #tpu.pipeline_mode<synchronous>, transform_indices = @transform_1, window_bounds = array<i64: 256, 32>}, {pipeline_mode = #tpu.pipeline_mode<synchronous>, transform_indices = @transform_2, window_bounds = array<i64: 1, 32>}, {transform_indices = @transform_3, window_bounds = array<i64: 128, 32>}]} {
    %c0 = arith.constant 0 : index
    %c0_0 = arith.constant 0 : index
    %0 = vector.load %arg1[%c0, %c0_0] : memref<128x256xbf16, #tpu.memory_space<vmem>>, vector<128x256xbf16>
    %c0_1 = arith.constant 0 : index
    %c0_2 = arith.constant 0 : index
    %1 = vector.load %arg2[%c0_1, %c0_2] : memref<256x32xbf16, #tpu.memory_space<vmem>>, vector<256x32xbf16>
    %cst = arith.constant dense<0.000000e+00> : vector<128x32xf32>
    %2 = tpu.matmul %0, %1, %cst {dimension_numbers = #tpu.dot_dimension_numbers<[1], [0], [0], [1], [0, 0, 1, 1], [], []>} : vector<128x256xbf16>, vector<256x32xbf16>, vector<128x32xf32> -> vector<128x32xf32>
    %c0_3 = arith.constant 0 : index
    %c0_4 = arith.constant 0 : index
    %3 = vector.load %arg3[%c0_3, %c0_4] : memref<1x32xf32, #tpu.memory_space<vmem>>, vector<1x32xf32>
    %4 = vector.broadcast %3 : vector<1x32xf32> to vector<128x32xf32>
    %5 = arith.addf %2, %4 : vector<128x32xf32>
    %cst_5 = arith.constant 0.000000e+00 : f32
    %6 = vector.broadcast %cst_5 : f32 to vector<128x32xf32>
    %7 = arith.cmpf ogt, %5, %6 : vector<128x32xf32>
    %cst_6 = arith.constant 2.000000e-01 : f32
    %8 = vector.broadcast %cst_6 : f32 to vector<128x32xf32>
    %9 = arith.mulf %8, %5 : vector<128x32xf32>
    %10 = arith.select %7, %5, %9 : vector<128x32xi1>, vector<128x32xf32>
    %11 = arith.truncf %10 : vector<128x32xf32> to vector<128x32xbf16>
    %c0_7 = arith.constant 0 : index
    %c0_8 = arith.constant 0 : index
    %12 = vector.load %arg4[%c0_7, %c0_8] : memref<128x32xbf16, #tpu.memory_space<vmem>>, vector<128x32xbf16>
    tpu.vector_store %arg4[%c0_7, %c0_8], %11 {strides = array<i32>} : memref<128x32xbf16, #tpu.memory_space<vmem>>, vector<128x32xbf16>,
    return
  }
  func.func @transform_0(%arg0: i32) -> (i32, i32) {
    %c0_i32 = arith.constant 0 : i32
    %c0_i32_0 = arith.constant 0 : i32
    return %arg0, %c0_i32 : i32, i32
  }
  func.func @transform_1(%arg0: i32) -> (i32, i32) {
    %c0_i32 = arith.constant 0 : i32
    %c0_i32_0 = arith.constant 0 : i32
    %c0_i32_1 = arith.constant 0 : i32
    return %c0_i32, %c0_i32_0 : i32, i32
  }
  func.func @transform_2(%arg0: i32) -> (i32, i32) {
    %c0_i32 = arith.constant 0 : i32
    %c0_i32_0 = arith.constant 0 : i32
    %c0_i32_1 = arith.constant 0 : i32
    return %c0_i32, %c0_i32_0 : i32, i32
  }
  func.func @transform_3(%arg0: i32) -> (i32, i32) {
    %c0_i32 = arith.constant 0 : i32
    %c0_i32_0 = arith.constant 0 : i32
    return %arg0, %c0_i32 : i32, i32
  }
}

module attributes {stable_mosaic.version = 11 : i64} {
  func.func @_fused_matmul_bias_act_kernel(%arg0: i32, %arg1: memref<32x512xbf16, #tpu.memory_space<vmem>>, %arg2: memref<512x64xbf16, #tpu.memory_space<vmem>>, %arg3: memref<1x64xf32, #tpu.memory_space<vmem>>, %arg4: memref<32x64xbf16, #tpu.memory_space<vmem>>) attributes {dimension_semantics = [#tpu.dimension_semantics<parallel>], iteration_bounds = array<i64: 1>, scalar_prefetch = 0 : i64, scratch_operands = 0 : i64, tpu.core_type = #tpu.core_type<tc>, window_params = [{transform_indices = @transform_0, window_bounds = array<i64: 32, 512>}, {pipeline_mode = #tpu.pipeline_mode<synchronous>, transform_indices = @transform_1, window_bounds = array<i64: 512, 64>}, {pipeline_mode = #tpu.pipeline_mode<synchronous>, transform_indices = @transform_2, window_bounds = array<i64: 1, 64>}, {transform_indices = @transform_3, window_bounds = array<i64: 32, 64>}]} {
    %c0 = arith.constant 0 : index
    %c0_0 = arith.constant 0 : index
    %0 = vector.load %arg1[%c0, %c0_0] : memref<32x512xbf16, #tpu.memory_space<vmem>>, vector<32x512xbf16>
    %c0_1 = arith.constant 0 : index
    %c0_2 = arith.constant 0 : index
    %1 = vector.load %arg2[%c0_1, %c0_2] : memref<512x64xbf16, #tpu.memory_space<vmem>>, vector<512x64xbf16>
    %cst = arith.constant dense<0.000000e+00> : vector<32x64xf32>
    %2 = tpu.matmul %0, %1, %cst {dimension_numbers = #tpu.dot_dimension_numbers<[1], [0], [0], [1], [0, 0, 1, 1], [], []>} : vector<32x512xbf16>, vector<512x64xbf16>, vector<32x64xf32> -> vector<32x64xf32>
    %c0_3 = arith.constant 0 : index
    %c0_4 = arith.constant 0 : index
    %3 = vector.load %arg3[%c0_3, %c0_4] : memref<1x64xf32, #tpu.memory_space<vmem>>, vector<1x64xf32>
    %4 = vector.broadcast %3 : vector<1x64xf32> to vector<32x64xf32>
    %5 = arith.addf %2, %4 : vector<32x64xf32>
    %cst_5 = arith.constant 0.000000e+00 : f32
    %6 = vector.broadcast %cst_5 : f32 to vector<32x64xf32>
    %7 = arith.cmpf ogt, %5, %6 : vector<32x64xf32>
    %cst_6 = arith.constant 2.000000e-01 : f32
    %8 = vector.broadcast %cst_6 : f32 to vector<32x64xf32>
    %9 = arith.mulf %8, %5 : vector<32x64xf32>
    %10 = arith.select %7, %5, %9 : vector<32x64xi1>, vector<32x64xf32>
    %11 = arith.truncf %10 : vector<32x64xf32> to vector<32x64xbf16>
    %c0_7 = arith.constant 0 : index
    %c0_8 = arith.constant 0 : index
    %12 = vector.load %arg4[%c0_7, %c0_8] : memref<32x64xbf16, #tpu.memory_space<vmem>>, vector<32x64xbf16>
    tpu.vector_store %arg4[%c0_7, %c0_8], %11 {strides = array<i32>} : memref<32x64xbf16, #tpu.memory_space<vmem>>, vector<32x64xbf16>,
    return
  }
  func.func @transform_0(%arg0: i32) -> (i32, i32) {
    %c0_i32 = arith.constant 0 : i32
    %c0_i32_0 = arith.constant 0 : i32
    return %arg0, %c0_i32 : i32, i32
  }
  func.func @transform_1(%arg0: i32) -> (i32, i32) {
    %c0_i32 = arith.constant 0 : i32
    %c0_i32_0 = arith.constant 0 : i32
    %c0_i32_1 = arith.constant 0 : i32
    return %c0_i32, %c0_i32_0 : i32, i32
  }
  func.func @transform_2(%arg0: i32) -> (i32, i32) {
    %c0_i32 = arith.constant 0 : i32
    %c0_i32_0 = arith.constant 0 : i32
    %c0_i32_1 = arith.constant 0 : i32
    return %c0_i32, %c0_i32_0 : i32, i32
  }
  func.func @transform_3(%arg0: i32) -> (i32, i32) {
    %c0_i32 = arith.constant 0 : i32
    %c0_i32_0 = arith.constant 0 : i32
    return %arg0, %c0_i32 : i32, i32
  }
}

module attributes {stable_mosaic.version = 11 : i64} {
  func.func @_fused_matmul_bias_act_kernel(%arg0: i32, %arg1: memref<8x1024xbf16, #tpu.memory_space<vmem>>, %arg2: memref<1024x1xbf16, #tpu.memory_space<vmem>>, %arg3: memref<1x1xf32, #tpu.memory_space<vmem>>, %arg4: memref<8x1xf32, #tpu.memory_space<vmem>>) attributes {dimension_semantics = [#tpu.dimension_semantics<parallel>], iteration_bounds = array<i64: 1>, scalar_prefetch = 0 : i64, scratch_operands = 0 : i64, tpu.core_type = #tpu.core_type<tc>, window_params = [{transform_indices = @transform_0, window_bounds = array<i64: 8, 1024>}, {pipeline_mode = #tpu.pipeline_mode<synchronous>, transform_indices = @transform_1, window_bounds = array<i64: 1024, 1>}, {pipeline_mode = #tpu.pipeline_mode<synchronous>, transform_indices = @transform_2, window_bounds = array<i64: 1, 1>}, {transform_indices = @transform_3, window_bounds = array<i64: 8, 1>}]} {
    %c0 = arith.constant 0 : index
    %c0_0 = arith.constant 0 : index
    %0 = vector.load %arg1[%c0, %c0_0] : memref<8x1024xbf16, #tpu.memory_space<vmem>>, vector<8x1024xbf16>
    %c0_1 = arith.constant 0 : index
    %c0_2 = arith.constant 0 : index
    %1 = vector.load %arg2[%c0_1, %c0_2] : memref<1024x1xbf16, #tpu.memory_space<vmem>>, vector<1024x1xbf16>
    %cst = arith.constant dense<0.000000e+00> : vector<8x1xf32>
    %2 = tpu.matmul %0, %1, %cst {dimension_numbers = #tpu.dot_dimension_numbers<[1], [0], [0], [1], [0, 0, 1, 1], [], []>} : vector<8x1024xbf16>, vector<1024x1xbf16>, vector<8x1xf32> -> vector<8x1xf32>
    %c0_3 = arith.constant 0 : index
    %c0_4 = arith.constant 0 : index
    %3 = vector.load %arg3[%c0_3, %c0_4] : memref<1x1xf32, #tpu.memory_space<vmem>>, vector<1x1xf32>
    %4 = vector.broadcast %3 : vector<1x1xf32> to vector<8x1xf32>
    %5 = arith.addf %2, %4 : vector<8x1xf32>
    %cst_5 = arith.constant 5.000000e-01 : f32
    %6 = vector.broadcast %cst_5 : f32 to vector<8x1xf32>
    %7 = arith.mulf %6, %5 : vector<8x1xf32>
    %8 = math.tanh %7 : vector<8x1xf32>
    %cst_6 = arith.constant 1.000000e+00 : f32
    %9 = vector.broadcast %cst_6 : f32 to vector<8x1xf32>
    %10 = arith.addf %8, %9 : vector<8x1xf32>
    %cst_7 = arith.constant 5.000000e-01 : f32
    %11 = vector.broadcast %cst_7 : f32 to vector<8x1xf32>
    %12 = arith.mulf %11, %10 : vector<8x1xf32>
    %c0_8 = arith.constant 0 : index
    %c0_9 = arith.constant 0 : index
    %13 = vector.load %arg4[%c0_8, %c0_9] : memref<8x1xf32, #tpu.memory_space<vmem>>, vector<8x1xf32>
    tpu.vector_store %arg4[%c0_8, %c0_9], %12 {strides = array<i32>} : memref<8x1xf32, #tpu.memory_space<vmem>>, vector<8x1xf32>,
    return
  }
  func.func @transform_0(%arg0: i32) -> (i32, i32) {
    %c0_i32 = arith.constant 0 : i32
    %c0_i32_0 = arith.constant 0 : i32
    return %arg0, %c0_i32 : i32, i32
  }
  func.func @transform_1(%arg0: i32) -> (i32, i32) {
    %c0_i32 = arith.constant 0 : i32
    %c0_i32_0 = arith.constant 0 : i32
    %c0_i32_1 = arith.constant 0 : i32
    return %c0_i32, %c0_i32_0 : i32, i32
  }
  func.func @transform_2(%arg0: i32) -> (i32, i32) {
    %c0_i32 = arith.constant 0 : i32
    %c0_i32_0 = arith.constant 0 : i32
    %c0_i32_1 = arith.constant 0 : i32
    return %c0_i32, %c0_i32_0 : i32, i32
  }
  func.func @transform_3(%arg0: i32) -> (i32, i32) {
    %c0_i32 = arith.constant 0 : i32
    %c0_i32_0 = arith.constant 0 : i32
    return %arg0, %c0_i32 : i32, i32
  }
}

</mosaic_0001>

<bundles_post_ra>
// kernel: discriminator_forward.4
= control target key start
LH: loop header
LB: loop body
LE: loop exit
PB: predicated region body
PF: predicated region fallthrough
CT: control target
= control target key end

     0   :  { %vm475_vm0 = vcmask 654336   ;;  %vm1166_vm2 = vcmask 125952   ;;  %s2526_s1 = inlined_call_operand.vmem [shape: bf16[208,16], index: 1, kind: input, shape index: {}]   ;;  %s2527_s0 = inlined_call_operand.vmem [shape: bf16[512,208], index: 0, kind: input, shape index: {}]   ;;  %s2528_s2 = inlined_call_operand.vmem [shape: f32[1,16], index: 2, kind: input, shape index: {}]   ;;  %s2529_s3 = inlined_call_operand.vmem [shape: bf16[512,16], index: 3, kind: output, shape index: {}]  }
   0x1   :  { %v1646_v0 = vld [vmem:[%s2526_s1 + $0x38] sm:$0xff]  ;;  %v1651_v1 = vld [vmem:[%s2526_s1 + $0x60] sm:$0xff]  ;;  %v1645_v2 = vld [vmem:[%s2526_s1 + $0x30] sm:$0xff] }
   0x2   :  { %572 = vmatpush.bf16.msra.mxu0 %v1646_v0  ;;  %1652 = vmatpush.bf16.msra.mxu2 %v1646_v0  ;;  %v1650_v3 = vld [vmem:[%s2526_s1 + $0x58] sm:$0xff]  ;;  %v1644_v4 = vld [vmem:[%s2526_s1 + $0x28] sm:$0xff]  ;;  %v1649_v5 = vld [vmem:[%s2526_s1 + $0x50] sm:$0xff] }
   0x3   :  { %744 = vmatpush.bf16.msra.mxu1 %v1651_v1  ;;  %1660 = vmatpush.bf16.msra.mxu3 %v1651_v1  ;;  %v1643_v6 = vld [vmem:[%s2526_s1 + $0x20] sm:$0xff]  ;;  %v1648_v7 = vld [vmem:[%s2526_s1 + $0x48] sm:$0xff]  ;;  %v1642_v8 = vld [vmem:[%s2526_s1 + $0x18] sm:$0xff] }
   0x4   :  { %v1647_v9 = vld [vmem:[%s2526_s1 + $0x40] sm:$0xff]  ;;  %v1239_v11 = vld [vmem:[%s2527_s0 + $0x8] sm:$0xf0]  ;;  %v1609_v12 = vld [vmem:[%s2527_s0 + $0x114] sm:$0xf] }
   0x5   :  { %v1575_v10 = vld [vmem:[%s2527_s0 + $0x4] sm:$0xf]  ;;  %v1375_v13 = vld [vmem:[%s2527_s0 + $0x118] sm:$0xf0]  ;;  %v1641_v15 = vld [vmem:[%s2526_s1 + $0x10] sm:$0xff] }
   0x6   :  { %573 = vmatpush.bf16.msra.mxu0 %v1645_v2  ;;  %1653 = vmatpush.bf16.msra.mxu2 %v1645_v2  ;;  %v1242_v14 = vor.u32 %v1575_v10, %v1239_v11  ;;  %v1378_v16 = vor.u32 %v1609_v12, %v1375_v13  ;;  %v1640_v17 = vld [vmem:[%s2526_s1 + $0x8] sm:$0xff]  ;;  %v1639_v18 = vld [vmem:[%s2526_s1] sm:$0xff]  ;;  %v1577_v25 = vld [vmem:[%s2527_s0 + $0x14] sm:$0xf] }
   0x7   :  { %745 = vmatpush.bf16.msra.mxu1 %v1650_v3  ;;  %1661 = vmatpush.bf16.msra.mxu3 %v1650_v3  ;;  %v1237_v19 = vld [vmem:[%s2527_s0] sm:$0xf]  ;;  %v1576_v20 = vld [vmem:[%s2527_s0 + $0x4] sm:$0xf0]  ;;  %v1247_v26 = vld [vmem:[%s2527_s0 + $0x18] sm:$0xf0] }
   0x8   :  { %v1365_v21 = vld [vmem:[%s2527_s0 + $0x100] sm:$0xf]  ;;  %v1608_v22 = vld [vmem:[%s2527_s0 + $0x104] sm:$0xf0]  ;;  %v1238_v23 = vor.u32 %v1576_v20, %v1237_v19  ;;  %v1611_v27 = vld [vmem:[%s2527_s0 + $0x124] sm:$0xf]  ;;  %v1250_v29 = vor.u32 %v1577_v25, %v1247_v26 }
   0x9   :  { %v1366_v24 = vor.u32 %v1608_v22, %v1365_v21  ;;  %v1383_v28 = vld [vmem:[%s2527_s0 + $0x128] sm:$0xf0]  ;;  %v1245_v31 = vld [vmem:[%s2527_s0 + $0x10] sm:$0xf]  ;;  %v1578_v32 = vld [vmem:[%s2527_s0 + $0x14] sm:$0xf0] }
   0xa   :  { %574 = vmatpush.bf16.msra.mxu0 %v1644_v4  ;;  %1654 = vmatpush.bf16.msra.mxu2 %v1644_v4  ;;  %v1386_v30 = vor.u32 %v1611_v27, %v1383_v28  ;;  %v1373_v33 = vld [vmem:[%s2527_s0 + $0x110] sm:$0xf]  ;;  %v1610_v34 = vld [vmem:[%s2527_s0 + $0x114] sm:$0xf0]  ;;  %v1246_v35 = vor.u32 %v1578_v32, %v1245_v31  ;;  %v1579_v37 = vld [vmem:[%s2527_s0 + $0x24] sm:$0xf] }
   0xb   :  { %746 = vmatpush.bf16.msra.mxu1 %v1649_v5  ;;  %1662 = vmatpush.bf16.msra.mxu3 %v1649_v5  ;;  %v1374_v36 = vor.u32 %v1610_v34, %v1373_v33  ;;  %v1255_v38 = vld [vmem:[%s2527_s0 + $0x28] sm:$0xf0]  ;;  %v1613_v39 = vld [vmem:[%s2527_s0 + $0x134] sm:$0xf]  ;;  %v1391_v40 = vld [vmem:[%s2527_s0 + $0x138] sm:$0xf0] }
   0xc   :  { %v1258_v41 = vor.u32 %v1579_v37, %v1255_v38  ;;  %v1394_v42 = vor.u32 %v1613_v39, %v1391_v40  ;;  %v1253_v43 = vld [vmem:[%s2527_s0 + $0x20] sm:$0xf]  ;;  %v1580_v44 = vld [vmem:[%s2527_s0 + $0x24] sm:$0xf0]  ;;  %v1581_v49 = vld [vmem:[%s2527_s0 + $0x34] sm:$0xf] }
   0xd   :  { %v1381_v45 = vld [vmem:[%s2527_s0 + $0x120] sm:$0xf]  ;;  %v1612_v46 = vld [vmem:[%s2527_s0 + $0x124] sm:$0xf0]  ;;  %v1254_v47 = vor.u32 %v1580_v44, %v1253_v43  ;;  %v1263_v50 = vld [vmem:[%s2527_s0 + $0x38] sm:$0xf0] }
   0xe   :  { %575 = vmatpush.bf16.msra.mxu0 %v1643_v6  ;;  %1655 = vmatpush.bf16.msra.mxu2 %v1643_v6  ;;  %v1382_v48 = vor.u32 %v1612_v46, %v1381_v45  ;;  %v1615_v51 = vld [vmem:[%s2527_s0 + $0x144] sm:$0xf]  ;;  %v1399_v52 = vld [vmem:[%s2527_s0 + $0x148] sm:$0xf0]  ;;  %v1266_v53 = vor.u32 %v1581_v49, %v1263_v50  ;;  %v1261_v55 = vld [vmem:[%s2527_s0 + $0x30] sm:$0xf] }
   0xf   :  { %747 = vmatpush.bf16.msra.mxu1 %v1648_v7  ;;  %1663 = vmatpush.bf16.msra.mxu3 %v1648_v7  ;;  %v1402_v54 = vor.u32 %v1615_v51, %v1399_v52  ;;  %v1582_v56 = vld [vmem:[%s2527_s0 + $0x34] sm:$0xf0]  ;;  %v1389_v57 = vld [vmem:[%s2527_s0 + $0x130] sm:$0xf]  ;;  %v1583_v61 = vld [vmem:[%s2527_s0 + $0x44] sm:$0xf] }
  0x10   :  { %v1614_v58 = vld [vmem:[%s2527_s0 + $0x134] sm:$0xf0]  ;;  %v1262_v59 = vor.u32 %v1582_v56, %v1261_v55  ;;  %v1271_v62 = vld [vmem:[%s2527_s0 + $0x48] sm:$0xf0]  ;;  %v1617_v63 = vld [vmem:[%s2527_s0 + $0x154] sm:$0xf] }
  0x11   :  { %v1390_v60 = vor.u32 %v1614_v58, %v1389_v57  ;;  %v1407_v0 = vld [vmem:[%s2527_s0 + $0x158] sm:$0xf0]  ;;  %v1274_v1 = vor.u32 %v1583_v61, %v1271_v62  ;;  %v1269_v3 = vld [vmem:[%s2527_s0 + $0x40] sm:$0xf]  ;;  %v1584_v4 = vld [vmem:[%s2527_s0 + $0x44] sm:$0xf0] }
  0x12   :  { %576 = vmatpush.bf16.msra.mxu0 %v1642_v8  ;;  %1656 = vmatpush.bf16.msra.mxu2 %v1642_v8  ;;  %v1410_v2 = vor.u32 %v1617_v63, %v1407_v0  ;;  %v1397_v5 = vld [vmem:[%s2527_s0 + $0x140] sm:$0xf]  ;;  %v1616_v6 = vld [vmem:[%s2527_s0 + $0x144] sm:$0xf0]  ;;  %v1270_v7 = vor.u32 %v1584_v4, %v1269_v3  ;;  %v1279_v10 = vld [vmem:[%s2527_s0 + $0x58] sm:$0xf0] }
  0x13   :  { %748 = vmatpush.bf16.msra.mxu1 %v1647_v9  ;;  %1664 = vmatpush.bf16.msra.mxu3 %v1647_v9  ;;  %v1398_v8 = vor.u32 %v1616_v6, %v1397_v5  ;;  %v1585_v9 = vld [vmem:[%s2527_s0 + $0x54] sm:$0xf]  ;;  %v1619_v11 = vld [vmem:[%s2527_s0 + $0x164] sm:$0xf]  ;;  %v1415_v12 = vld [vmem:[%s2527_s0 + $0x168] sm:$0xf0] }
  0x14   :  { %v1282_v13 = vor.u32 %v1585_v9, %v1279_v10  ;;  %v1587_v21 = vld [vmem:[%s2527_s0 + $0x64] sm:$0xf]  ;;  %v1287_v22 = vld [vmem:[%s2527_s0 + $0x68] sm:$0xf0]  ;;  %v1285_v27 = vld [vmem:[%s2527_s0 + $0x60] sm:$0xf] }
  0x15   :  { %v1290_v25 = vor.u32 %v1587_v21, %v1287_v22  ;;  %v1588_v28 = vld [vmem:[%s2527_s0 + $0x64] sm:$0xf0]  ;;  %v1589_v33 = vld [vmem:[%s2527_s0 + $0x74] sm:$0xf]  ;;  %v1295_v34 = vld [vmem:[%s2527_s0 + $0x78] sm:$0xf0] }
  0x16   :  { %1543 = vmatmul.msk.bf16.vlgmr.msra.gmra.mxu1 %vm475_vm0, %v1242_v14  ;;  %577 = vmatpush.bf16.msra.mxu0 %v1641_v15  ;;  %v1418_v14 = vor.u32 %v1619_v11, %v1415_v12  ;;  %v1286_v31 = vor.u32 %v1588_v28, %v1285_v27  ;;  %v1298_v37 = vor.u32 %v1589_v33, %v1295_v34  ;;  %v1293_v39 = vld [vmem:[%s2527_s0 + $0x70] sm:$0xf]  ;;  %v1590_v40 = vld [vmem:[%s2527_s0 + $0x74] sm:$0xf0]  ;;  %v1591_v45 = vld [vmem:[%s2527_s0 + $0x84] sm:$0xf] }
  0x17   :  { %1657 = vmatpush.bf16.msra.mxu2 %v1641_v15  ;;  %1560 = vmatmul.msk.bf16.vlgmr.msra.gmra.mxu3 %vm475_vm0, %v1378_v16  ;;  %v1277_v15 = vld [vmem:[%s2527_s0 + $0x50] sm:$0xf]  ;;  %v1586_v16 = vld [vmem:[%s2527_s0 + $0x54] sm:$0xf0]  ;;  %v1294_v43 = vor.u32 %v1590_v40, %v1293_v39  ;;  %v1303_v46 = vld [vmem:[%s2527_s0 + $0x88] sm:$0xf0] }
  0x18   :  { %v1278_v19 = vor.u32 %v1586_v16, %v1277_v15  ;;  %v1306_v49 = vor.u32 %v1591_v45, %v1303_v46  ;;  %v1301_v52 = vld [vmem:[%s2527_s0 + $0x80] sm:$0xf]  ;;  %v1624_v58 = vld [vmem:[%s2527_s0 + $0x184] sm:$0xf0]  ;;  %v1593_v63 = vld [vmem:[%s2527_s0 + $0x94] sm:$0xf] }
  0x19   :  { %v1959_v56 = vld [vmem:[%s2528_s2] ss:$0 sm:$0xff]  ;;  %v1311_v0 = vld [vmem:[%s2527_s0 + $0x98] sm:$0xf0]  ;;  %v1309_v15 = vld [vmem:[%s2527_s0 + $0x90] sm:$0xf] }
  0x1a   :  { %578 = vmatpush.bf16.msra.mxu0 %v1640_v17  ;;  %v1429_v57 = vld [vmem:[%s2527_s0 + $0x180] sm:$0xf]  ;;  %v1314_v4 = vor.u32 %v1593_v63, %v1311_v0  ;;  %v1594_v16 = vld [vmem:[%s2527_s0 + $0x94] sm:$0xf0] }
  0x1b   :  { %1658 = vmatpush.bf16.msra.mxu2 %v1640_v17  ;;  %v1405_v17 = vld [vmem:[%s2527_s0 + $0x150] sm:$0xf]  ;;  %v1430_v61 = vor.u32 %v1624_v58, %v1429_v57  ;;  %v1626_v21 = vld [vmem:[%s2527_s0 + $0x194] sm:$0xf0] }
  0x1e   :  { %579 = vmatpush.bf16.msra.mxu0 %v1639_v18 }
  0x1f   :  { %1659 = vmatpush.bf16.msra.mxu2 %v1639_v18  ;;  %v1618_v18 = vld [vmem:[%s2527_s0 + $0x154] sm:$0xf0] }
  0x20   :  { %v1406_v20 = vor.u32 %v1618_v18, %v1405_v17  ;;  %v1437_v17 = vld [vmem:[%s2527_s0 + $0x190] sm:$0xf] }
  0x21   :  { %580 = vmatmul.bf16.vlgmr.msra.gmra.mxu0 %v1238_v23  ;;  %v1621_v23 = vld [vmem:[%s2527_s0 + $0x174] sm:$0xf]  ;;  %v1438_v27 = vor.u32 %v1626_v21, %v1437_v17 }
  0x22   :  { %660 = vmatmul.bf16.vlgmr.msra.gmra.mxu2 %v1366_v24  ;;  %v1423_v24 = vld [vmem:[%s2527_s0 + $0x178] sm:$0xf0] }
  0x23   :  { %v1426_v26 = vor.u32 %v1621_v23, %v1423_v24  ;;  %v1310_v24 = vor.u32 %v1594_v16, %v1309_v15 }
  0x26   :  { %1544 = vmatmul.msk.bf16.gmra.mxu1 %vm475_vm0, %v1250_v29  ;;  %v1413_v29 = vld [vmem:[%s2527_s0 + $0x160] sm:$0xf] }
  0x27   :  { %1561 = vmatmul.msk.bf16.gmra.mxu3 %vm475_vm0, %v1386_v30  ;;  %v1620_v30 = vld [vmem:[%s2527_s0 + $0x164] sm:$0xf0] }
  0x28   :  { %v1414_v32 = vor.u32 %v1620_v30, %v1413_v29  ;;  %v1595_v29 = vld [vmem:[%s2527_s0 + $0xa4] sm:$0xf]  ;;  %v1319_v30 = vld [vmem:[%s2527_s0 + $0xa8] sm:$0xf0] }
  0x29   :  { %v1322_v34 = vor.u32 %v1595_v29, %v1319_v30  ;;  %v1453_v30 = vld [vmem:[%s2527_s0 + $0x1b0] sm:$0xf] }
  0x31   :  { %585 = vmatmul.bf16.gmra.mxu0 %v1246_v35  ;;  %v1623_v35 = vld [vmem:[%s2527_s0 + $0x184] sm:$0xf] }
  0x32   :  { %665 = vmatmul.bf16.gmra.mxu2 %v1374_v36  ;;  %v1431_v36 = vld [vmem:[%s2527_s0 + $0x188] sm:$0xf0] }
  0x33   :  { %v1434_v38 = vor.u32 %v1623_v35, %v1431_v36 }
  0x36   :  { %1545 = vmatmul.msk.bf16.gmra.mxu1 %vm475_vm0, %v1258_v41  ;;  %v1421_v41 = vld [vmem:[%s2527_s0 + $0x170] sm:$0xf] }
  0x37   :  { %1562 = vmatmul.msk.bf16.gmra.mxu3 %vm475_vm0, %v1394_v42  ;;  %v1622_v42 = vld [vmem:[%s2527_s0 + $0x174] sm:$0xf0] }
  0x38   :  { %v1422_v44 = vor.u32 %v1622_v42, %v1421_v41 }
  0x41   :  { %590 = vmatmul.bf16.gmra.mxu0 %v1254_v47  ;;  %v1625_v47 = vld [vmem:[%s2527_s0 + $0x194] sm:$0xf] }
  0x42   :  { %670 = vmatmul.bf16.gmra.mxu2 %v1382_v48  ;;  %v1439_v48 = vld [vmem:[%s2527_s0 + $0x198] sm:$0xf0] }
  0x43   :  { %v1442_v51 = vor.u32 %v1625_v47, %v1439_v48  ;;  %v1317_v47 = vld [vmem:[%s2527_s0 + $0xa0] sm:$0xf]  ;;  %v1596_v48 = vld [vmem:[%s2527_s0 + $0xa4] sm:$0xf0] }
  0x46   :  { %1546 = vmatmul.msk.bf16.gmra.mxu1 %vm475_vm0, %v1266_v53  ;;  %v1592_v53 = vld [vmem:[%s2527_s0 + $0x84] sm:$0xf0] }
  0x47   :  { %1563 = vmatmul.msk.bf16.gmra.mxu3 %vm475_vm0, %v1402_v54 }
  0x51   :  { %595 = vmatmul.bf16.gmra.mxu0 %v1262_v59  ;;  %v1302_v59 = vor.u32 %v1592_v53, %v1301_v52 }
  0x52   :  { %675 = vmatmul.bf16.gmra.mxu2 %v1390_v60 }
  0x56   :  { %1547 = vmatmul.msk.bf16.gmra.mxu1 %vm475_vm0, %v1274_v1  ;;  %v1627_v1 = vld [vmem:[%s2527_s0 + $0x1a4] sm:$0xf] }
  0x57   :  { %1564 = vmatmul.msk.bf16.gmra.mxu3 %vm475_vm0, %v1410_v2  ;;  %v1447_v2 = vld [vmem:[%s2527_s0 + $0x1a8] sm:$0xf0] }
  0x61   :  { %600 = vmatmul.bf16.gmra.mxu0 %v1270_v7 }
  0x62   :  { %680 = vmatmul.bf16.gmra.mxu2 %v1398_v8  ;;  %v1450_v8 = vor.u32 %v1627_v1, %v1447_v2  ;;  %v1597_v2 = vld [vmem:[%s2527_s0 + $0xb4] sm:$0xf] }
  0x66   :  { %1548 = vmatmul.msk.bf16.gmra.mxu1 %vm475_vm0, %v1282_v13 }
  0x67   :  { %1565 = vmatmul.msk.bf16.gmra.mxu3 %vm475_vm0, %v1418_v14 }
  0x71   :  { %605 = vmatmul.bf16.gmra.mxu0 %v1278_v19 }
  0x72   :  { %685 = vmatmul.bf16.gmra.mxu2 %v1406_v20 }
  0x76   :  { %1549 = vmatmul.msk.bf16.gmra.mxu1 %vm475_vm0, %v1290_v25 }
  0x77   :  { %1566 = vmatmul.msk.bf16.gmra.mxu3 %vm475_vm0, %v1426_v26 }
  0x81   :  { %610 = vmatmul.bf16.gmra.mxu0 %v1286_v31  ;;  %v1629_v31 = vld [vmem:[%s2527_s0 + $0x1b4] sm:$0xf] }
  0x82   :  { %690 = vmatmul.bf16.gmra.mxu2 %v1414_v32  ;;  %v1455_v32 = vld [vmem:[%s2527_s0 + $0x1b8] sm:$0xf0] }
  0x86   :  { %1550 = vmatmul.msk.bf16.gmra.mxu1 %vm475_vm0, %v1298_v37 }
  0x87   :  { %1567 = vmatmul.msk.bf16.gmra.mxu3 %vm475_vm0, %v1434_v38  ;;  %v1458_v38 = vor.u32 %v1629_v31, %v1455_v32 }
  0x91   :  { %615 = vmatmul.bf16.gmra.mxu0 %v1294_v43 }
  0x92   :  { %695 = vmatmul.bf16.gmra.mxu2 %v1422_v44 }
  0x93   :  { %v750_v50 = vpop.f32.mrf.mxu1 }
  0x96   :  { %1551 = vmatmul.msk.bf16.gmra.mxu1 %vm475_vm0, %v1306_v49 }
  0x97   :  { %1568 = vmatmul.msk.bf16.gmra.mxu3 %vm475_vm0, %v1442_v51 }
  0x9a   :  { %v1954_v54 = vpop.f32.mrf.mxu3 }
  0x9b   :  { %v752_v55 = vpop.f32.mrf.mxu1 }
  0x9e   :  { %v581_v60 = vpop.f32.mrf.mxu0 }
  0x9f   :  { %v582_v62 = vadd.f32 %v1959_v56, %v581_v60  ;;  %v1318_v60 = vor.u32 %v1596_v48, %v1317_v47  ;;  %v1633_v48 = vld [vmem:[%s2527_s0 + $0x1d4] sm:$0xf] }
  0xa1   :  { %v751_v3 = vadd.f32 %v750_v50, %v582_v62  ;;  %620 = vmatmul.bf16.gmra.mxu0 %v1302_v59  ;;  %v1445_v50 = vld [vmem:[%s2527_s0 + $0x1a0] sm:$0xf] }
  0xa2   :  { %700 = vmatmul.bf16.gmra.mxu2 %v1430_v61  ;;  %v1980_v5 = vpop.f32.mrf.mxu3 }
  0xa3   :  { %vm910_vm1 = vcmp.gt.f32.partialorder %v751_v3, 0.0  ;;  %v974_v6 = vmul.f32 0.2, %v751_v3  ;;  %v755_v7 = vpop.f32.mrf.mxu1 }
  0xa5   :  { %v1038_v9 = vsel %vm910_vm1, %v751_v3, %v974_v6  ;;  %v1982_v10 = vpop.f32.mrf.mxu2  ;;  %v1327_v3 = vld [vmem:[%s2527_s0 + $0xb8] sm:$0xf0]  ;;  %v1631_v6 = vld [vmem:[%s2527_s0 + $0x1c4] sm:$0xf] }
  0xa6   :  { %v1102_v11 = vpack.c.bf16 %v1038_v9, %v1038_v9  ;;  %1552 = vmatmul.msk.bf16.gmra.mxu1 %vm475_vm0, %v1314_v4  ;;  %v583_v12 = vpop.f32.mrf.mxu0 }
  0xa7   :  { %v584_v13 = vadd.f32 %v1959_v56, %v583_v12  ;;  %1569 = vmatmul.msk.bf16.gmra.mxu3 %vm475_vm0, %v1450_v8 }
  0xa8   :  { %1167 = vst.msk [vmem:[%s2529_s3] sm:$0xf] %vm1166_vm2, %v1102_v11  ;;  %v1330_v11 = vor.u32 %v1597_v2, %v1327_v3 }
  0xa9   :  { %v753_v14 = vadd.f32 %v752_v55, %v584_v13 }
  0xaa   :  { %v2000_v18 = vpop.f32.mrf.mxu3 }
  0xab   :  { %vm911_vm3 = vcmp.gt.f32.partialorder %v753_v14, 0.0  ;;  %v975_v19 = vmul.f32 0.2, %v753_v14  ;;  %v757_v20 = vpop.f32.mrf.mxu1 }
  0xad   :  { %v1039_v22 = vsel %vm911_vm3, %v753_v14, %v975_v19  ;;  %v2005_v23 = vpop.f32.mrf.mxu2 }
  0xae   :  { %v1103_v25 = vpack.c.bf16 %v1039_v22, %v1039_v22  ;;  %v586_v26 = vpop.f32.mrf.mxu0 }
  0xaf   :  { %v587_v28 = vadd.f32 %v1959_v56, %v586_v26 }
  0xb0   :  { %1168 = vst.msk [vmem:[%s2529_s3 + $0x4] sm:$0xf] %vm1166_vm2, %v1103_v25 }
  0xb1   :  { %v756_v33 = vadd.f32 %v755_v7, %v587_v28  ;;  %625 = vmatmul.bf16.gmra.mxu0 %v1310_v24  ;;  %v1463_v7 = vld [vmem:[%s2527_s0 + $0x1c8] sm:$0xf0]  ;;  %v1598_v28 = vld [vmem:[%s2527_s0 + $0xb4] sm:$0xf0] }
  0xb2   :  { %705 = vmatmul.bf16.gmra.mxu2 %v1438_v27  ;;  %v2024_v35 = vpop.f32.mrf.mxu3  ;;  %v1325_v27 = vld [vmem:[%s2527_s0 + $0xb0] sm:$0xf] }
  0xb3   :  { %vm912_vm4 = vcmp.gt.f32.partialorder %v756_v33, 0.0  ;;  %v976_v36 = vmul.f32 0.2, %v756_v33  ;;  %v760_v37 = vpop.f32.mrf.mxu1 }
  0xb5   :  { %v1040_v39 = vsel %vm912_vm4, %v756_v33, %v976_v36  ;;  %v666_v40 = vpop.f32.mrf.mxu2  ;;  %v1630_v33 = vld [vmem:[%s2527_s0 + $0x1b4] sm:$0xf0] }
  0xb6   :  { %v1104_v41 = vpack.c.bf16 %v1040_v39, %v1040_v39  ;;  %v667_v42 = vadd.f32 %v1959_v56, %v666_v40  ;;  %1553 = vmatmul.msk.bf16.gmra.mxu1 %vm475_vm0, %v1322_v34  ;;  %v588_v43 = vpop.f32.mrf.mxu0  ;;  %v1326_v39 = vor.u32 %v1598_v28, %v1325_v27  ;;  %v1635_v28 = vld [vmem:[%s2527_s0 + $0x1e4] sm:$0xf] }
  0xb7   :  { %v589_v44 = vadd.f32 %v1959_v56, %v588_v43  ;;  %1570 = vmatmul.msk.bf16.gmra.mxu3 %vm475_vm0, %v1458_v38  ;;  %v1454_v43 = vor.u32 %v1630_v33, %v1453_v30 }
  0xb8   :  { %1169 = vst.msk [vmem:[%s2529_s3 + $0x8] sm:$0xf] %vm1166_vm2, %v1104_v41  ;;  %v836_v45 = vadd.f32 %v1954_v54, %v667_v42  ;;  %v1628_v54 = vld [vmem:[%s2527_s0 + $0x1a4] sm:$0xf0] }
  0xb9   :  { %v758_v46 = vadd.f32 %v757_v20, %v589_v44  ;;  %v1446_v0 = vor.u32 %v1628_v54, %v1445_v50 }
  0xba   :  { %vm944_vm5 = vcmp.gt.f32.partialorder %v836_v45, 0.0  ;;  %v1008_v49 = vmul.f32 0.2, %v836_v45  ;;  %v2044_v51 = vpop.f32.mrf.mxu3 }
  0xbb   :  { %vm913_vm6 = vcmp.gt.f32.partialorder %v758_v46, 0.0  ;;  %v977_v52 = vmul.f32 0.2, %v758_v46  ;;  %v762_v53 = vpop.f32.mrf.mxu1 }
  0xbc   :  { %v1072_v55 = vsel %vm944_vm5, %v836_v45, %v1008_v49  ;;  %v1599_v45 = vld [vmem:[%s2527_s0 + $0xc4] sm:$0xf]  ;;  %v1471_v49 = vld [vmem:[%s2527_s0 + $0x1d8] sm:$0xf0] }
  0xbd   :  { %v1136_v57 = vpack.c.bf16 %v1072_v55, %v1072_v55  ;;  %v1041_v58 = vsel %vm913_vm6, %v758_v46, %v977_v52  ;;  %v668_v59 = vpop.f32.mrf.mxu2  ;;  %v1335_v46 = vld [vmem:[%s2527_s0 + $0xc8] sm:$0xf0] }
  0xbe   :  { %v1105_v61 = vpack.c.bf16 %v1041_v58, %v1041_v58  ;;  %v669_v62 = vadd.f32 %v1959_v56, %v668_v59  ;;  %v591_v63 = vpop.f32.mrf.mxu0 }
  0xbf   :  { %1201 = vst.msk [vmem:[%s2529_s3 + $0x88] sm:$0xf] %vm1166_vm2, %v1136_v57  ;;  %v592_v1 = vadd.f32 %v1959_v56, %v591_v63 }
  0xc0   :  { %1170 = vst.msk [vmem:[%s2529_s3 + $0xc] sm:$0xf] %vm1166_vm2, %v1105_v61  ;;  %v838_v4 = vadd.f32 %v1980_v5, %v669_v62  ;;  %v1466_v5 = vor.u32 %v1631_v6, %v1463_v7  ;;  %v1600_v6 = vld [vmem:[%s2527_s0 + $0xc4] sm:$0xf0] }
  0xc1   :  { %v761_v8 = vadd.f32 %v760_v37, %v592_v1  ;;  %630 = vmatmul.bf16.gmra.mxu0 %v1318_v60 }
  0xc2   :  { %vm945_vm7 = vcmp.gt.f32.partialorder %v838_v4, 0.0  ;;  %v1009_v9 = vmul.f32 0.2, %v838_v4  ;;  %710 = vmatmul.bf16.gmra.mxu2 %v1446_v0  ;;  %v2072_v12 = vpop.f32.mrf.mxu3 }
  0xc3   :  { %vm914_vm8 = vcmp.gt.f32.partialorder %v761_v8, 0.0  ;;  %v978_v13 = vmul.f32 0.2, %v761_v8  ;;  %v765_v14 = vpop.f32.mrf.mxu1 }
  0xc4   :  { %v1073_v15 = vsel %vm945_vm7, %v838_v4, %v1009_v9  ;;  %v1333_v4 = vld [vmem:[%s2527_s0 + $0xc0] sm:$0xf] }
  0xc5   :  { %v1137_v16 = vpack.c.bf16 %v1073_v15, %v1073_v15  ;;  %v1042_v17 = vsel %vm914_vm8, %v761_v8, %v978_v13  ;;  %v671_v19 = vpop.f32.mrf.mxu2  ;;  %v1461_v8 = vld [vmem:[%s2527_s0 + $0x1c0] sm:$0xf]  ;;  %v1632_v13 = vld [vmem:[%s2527_s0 + $0x1c4] sm:$0xf0] }
  0xc6   :  { %v1106_v20 = vpack.c.bf16 %v1042_v17, %v1042_v17  ;;  %v672_v21 = vadd.f32 %v1959_v56, %v671_v19  ;;  %1554 = vmatmul.msk.bf16.gmra.mxu1 %vm475_vm0, %v1330_v11  ;;  %v593_v22 = vpop.f32.mrf.mxu0  ;;  %v1334_v17 = vor.u32 %v1600_v6, %v1333_v4  ;;  %v1637_v6 = vld [vmem:[%s2527_s0 + $0x1f4] sm:$0xf] }
  0xc7   :  { %1202 = vst.msk [vmem:[%s2529_s3 + $0x8c] sm:$0xf] %vm1166_vm2, %v1137_v16  ;;  %v594_v24 = vadd.f32 %v1959_v56, %v593_v22  ;;  %1571 = vmatmul.msk.bf16.gmra.mxu3 %vm475_vm0, %v1466_v5  ;;  %v1462_v22 = vor.u32 %v1632_v13, %v1461_v8 }
  0xc8   :  { %1171 = vst.msk [vmem:[%s2529_s3 + $0x10] sm:$0xf] %vm1166_vm2, %v1106_v20  ;;  %v841_v25 = vadd.f32 %v2000_v18, %v672_v21 }
  0xc9   :  { %v763_v26 = vadd.f32 %v762_v53, %v594_v24  ;;  %v1338_v53 = vor.u32 %v1599_v45, %v1335_v46 }
  0xca   :  { %vm946_vm9 = vcmp.gt.f32.partialorder %v841_v25, 0.0  ;;  %v1010_v29 = vmul.f32 0.2, %v841_v25  ;;  %v2096_v31 = vpop.f32.mrf.mxu3 }
  0xcb   :  { %vm915_vm10 = vcmp.gt.f32.partialorder %v763_v26, 0.0  ;;  %v979_v32 = vmul.f32 0.2, %v763_v26  ;;  %v767_v18 = vpop.f32.mrf.mxu1 }
  0xcc   :  { %v1074_v34 = vsel %vm946_vm9, %v841_v25, %v1010_v29  ;;  %v1601_v25 = vld [vmem:[%s2527_s0 + $0xd4] sm:$0xf]  ;;  %v1479_v29 = vld [vmem:[%s2527_s0 + $0x1e8] sm:$0xf0] }
  0xcd   :  { %v1138_v36 = vpack.c.bf16 %v1074_v34, %v1074_v34  ;;  %v1043_v37 = vsel %vm915_vm10, %v763_v26, %v979_v32  ;;  %v673_v38 = vpop.f32.mrf.mxu2  ;;  %v1343_v26 = vld [vmem:[%s2527_s0 + $0xd8] sm:$0xf0] }
  0xce   :  { %v1107_v40 = vpack.c.bf16 %v1043_v37, %v1043_v37  ;;  %v674_v41 = vadd.f32 %v1959_v56, %v673_v38  ;;  %v596_v42 = vpop.f32.mrf.mxu0 }
  0xcf   :  { %1203 = vst.msk [vmem:[%s2529_s3 + $0x90] sm:$0xf] %vm1166_vm2, %v1138_v36  ;;  %v597_v44 = vadd.f32 %v1959_v56, %v596_v42 }
  0xd0   :  { %1172 = vst.msk [vmem:[%s2529_s3 + $0x14] sm:$0xf] %vm1166_vm2, %v1107_v40  ;;  %v843_v47 = vadd.f32 %v2024_v35, %v674_v41  ;;  %v1474_v35 = vor.u32 %v1633_v48, %v1471_v49  ;;  %v1602_v48 = vld [vmem:[%s2527_s0 + $0xd4] sm:$0xf0] }
  0xd1   :  { %v766_v50 = vadd.f32 %v765_v14, %v597_v44  ;;  %635 = vmatmul.bf16.gmra.mxu0 %v1326_v39 }
  0xd2   :  { %vm947_vm11 = vcmp.gt.f32.partialorder %v843_v47, 0.0  ;;  %v1011_v52 = vmul.f32 0.2, %v843_v47  ;;  %715 = vmatmul.bf16.gmra.mxu2 %v1454_v43  ;;  %v2124_v54 = vpop.f32.mrf.mxu3 }
  0xd3   :  { %vm916_vm12 = vcmp.gt.f32.partialorder %v766_v50, 0.0  ;;  %v980_v55 = vmul.f32 0.2, %v766_v50  ;;  %v770_v57 = vpop.f32.mrf.mxu1 }
  0xd4   :  { %v1075_v58 = vsel %vm947_vm11, %v843_v47, %v1011_v52  ;;  %v1341_v47 = vld [vmem:[%s2527_s0 + $0xd0] sm:$0xf] }
  0xd5   :  { %v1139_v59 = vpack.c.bf16 %v1075_v58, %v1075_v58  ;;  %v1044_v60 = vsel %vm916_vm12, %v766_v50, %v980_v55  ;;  %v676_v61 = vpop.f32.mrf.mxu2  ;;  %v1469_v50 = vld [vmem:[%s2527_s0 + $0x1d0] sm:$0xf]  ;;  %v1634_v55 = vld [vmem:[%s2527_s0 + $0x1d4] sm:$0xf0] }
  0xd6   :  { %v1108_v62 = vpack.c.bf16 %v1044_v60, %v1044_v60  ;;  %v677_v63 = vadd.f32 %v1959_v56, %v676_v61  ;;  %1555 = vmatmul.msk.bf16.gmra.mxu1 %vm475_vm0, %v1338_v53  ;;  %v598_v0 = vpop.f32.mrf.mxu0  ;;  %v1342_v60 = vor.u32 %v1602_v48, %v1341_v47 }
  0xd7   :  { %1204 = vst.msk [vmem:[%s2529_s3 + $0x94] sm:$0xf] %vm1166_vm2, %v1139_v59  ;;  %v599_v1 = vadd.f32 %v1959_v56, %v598_v0  ;;  %1572 = vmatmul.msk.bf16.gmra.mxu3 %vm475_vm0, %v1474_v35  ;;  %v1470_v0 = vor.u32 %v1634_v55, %v1469_v50 }
  0xd8   :  { %1173 = vst.msk [vmem:[%s2529_s3 + $0x18] sm:$0xf] %vm1166_vm2, %v1108_v62  ;;  %v846_v2 = vadd.f32 %v2044_v51, %v677_v63 }
  0xd9   :  { %v768_v3 = vadd.f32 %v767_v18, %v599_v1  ;;  %v1346_v18 = vor.u32 %v1601_v25, %v1343_v26 }
  0xda   :  { %vm948_vm13 = vcmp.gt.f32.partialorder %v846_v2, 0.0  ;;  %v1012_v7 = vmul.f32 0.2, %v846_v2  ;;  %v2148_v9 = vpop.f32.mrf.mxu3 }
  0xdb   :  { %vm917_vm14 = vcmp.gt.f32.partialorder %v768_v3, 0.0  ;;  %v981_v11 = vmul.f32 0.2, %v768_v3  ;;  %v772_v51 = vpop.f32.mrf.mxu1 }
  0xdc   :  { %v1076_v14 = vsel %vm948_vm13, %v846_v2, %v1012_v7  ;;  %v1603_v2 = vld [vmem:[%s2527_s0 + $0xe4] sm:$0xf]  ;;  %v1487_v7 = vld [vmem:[%s2527_s0 + $0x1f8] sm:$0xf0] }
  0xdd   :  { %v1140_v5 = vpack.c.bf16 %v1076_v14, %v1076_v14  ;;  %v1045_v15 = vsel %vm917_vm14, %v768_v3, %v981_v11  ;;  %v678_v16 = vpop.f32.mrf.mxu2  ;;  %v1351_v3 = vld [vmem:[%s2527_s0 + $0xe8] sm:$0xf0] }
  0xde   :  { %v1109_v19 = vpack.c.bf16 %v1045_v15, %v1045_v15  ;;  %v679_v20 = vadd.f32 %v1959_v56, %v678_v16  ;;  %v601_v21 = vpop.f32.mrf.mxu0 }
  0xdf   :  { %1205 = vst.msk [vmem:[%s2529_s3 + $0x98] sm:$0xf] %vm1166_vm2, %v1140_v5  ;;  %v602_v24 = vadd.f32 %v1959_v56, %v601_v21 }
  0xe0   :  { %1174 = vst.msk [vmem:[%s2529_s3 + $0x1c] sm:$0xf] %vm1166_vm2, %v1109_v19  ;;  %v848_v27 = vadd.f32 %v2072_v12, %v679_v20  ;;  %v1482_v12 = vor.u32 %v1635_v28, %v1479_v29  ;;  %v1604_v28 = vld [vmem:[%s2527_s0 + $0xe4] sm:$0xf0] }
  0xe1   :  { %v771_v30 = vadd.f32 %v770_v57, %v602_v24  ;;  %640 = vmatmul.bf16.gmra.mxu0 %v1334_v17 }
  0xe2   :  { %vm949_vm15 = vcmp.gt.f32.partialorder %v848_v27, 0.0  ;;  %v1013_v32 = vmul.f32 0.2, %v848_v27  ;;  %720 = vmatmul.bf16.gmra.mxu2 %v1462_v22  ;;  %v2176_v33 = vpop.f32.mrf.mxu3 }
  0xe3   :  { %vm918_vm1 = vcmp.gt.f32.partialorder %v771_v30, 0.0  ;;  %v982_v34 = vmul.f32 0.2, %v771_v30  ;;  %v775_v36 = vpop.f32.mrf.mxu1 }
  0xe4   :  { %v1077_v37 = vsel %vm949_vm15, %v848_v27, %v1013_v32  ;;  %v1349_v27 = vld [vmem:[%s2527_s0 + $0xe0] sm:$0xf] }
  0xe5   :  { %v1141_v38 = vpack.c.bf16 %v1077_v37, %v1077_v37  ;;  %v1046_v39 = vsel %vm918_vm1, %v771_v30, %v982_v34  ;;  %v681_v40 = vpop.f32.mrf.mxu2  ;;  %v1477_v30 = vld [vmem:[%s2527_s0 + $0x1e0] sm:$0xf]  ;;  %v1636_v34 = vld [vmem:[%s2527_s0 + $0x1e4] sm:$0xf0] }
  0xe6   :  { %v1110_v41 = vpack.c.bf16 %v1046_v39, %v1046_v39  ;;  %v682_v42 = vadd.f32 %v1959_v56, %v681_v40  ;;  %1556 = vmatmul.msk.bf16.gmra.mxu1 %vm475_vm0, %v1346_v18  ;;  %v603_v43 = vpop.f32.mrf.mxu0  ;;  %v1350_v39 = vor.u32 %v1604_v28, %v1349_v27 }
  0xe7   :  { %1206 = vst.msk [vmem:[%s2529_s3 + $0x9c] sm:$0xf] %vm1166_vm2, %v1141_v38  ;;  %v604_v44 = vadd.f32 %v1959_v56, %v603_v43  ;;  %1573 = vmatmul.msk.bf16.gmra.mxu3 %vm475_vm0, %v1482_v12  ;;  %v1478_v43 = vor.u32 %v1636_v34, %v1477_v30 }
  0xe8   :  { %1175 = vst.msk [vmem:[%s2529_s3 + $0x20] sm:$0xf] %vm1166_vm2, %v1110_v41  ;;  %v851_v45 = vadd.f32 %v2096_v31, %v682_v42 }
  0xe9   :  { %v773_v46 = vadd.f32 %v772_v51, %v604_v44  ;;  %v1354_v51 = vor.u32 %v1603_v2, %v1351_v3  ;;  %v1606_v2 = vld [vmem:[%s2527_s0 + $0xf4] sm:$0xf0] }
  0xea   :  { %vm950_vm3 = vcmp.gt.f32.partialorder %v851_v45, 0.0  ;;  %v1014_v49 = vmul.f32 0.2, %v851_v45  ;;  %v2200_v52 = vpop.f32.mrf.mxu3 }
  0xeb   :  { %vm919_vm4 = vcmp.gt.f32.partialorder %v773_v46, 0.0  ;;  %v983_v53 = vmul.f32 0.2, %v773_v46  ;;  %v777_v31 = vpop.f32.mrf.mxu1 }
  0xec   :  { %v1078_v57 = vsel %vm950_vm3, %v851_v45, %v1014_v49  ;;  %v1605_v45 = vld [vmem:[%s2527_s0 + $0xf4] sm:$0xf] }
  0xed   :  { %v1142_v35 = vpack.c.bf16 %v1078_v57, %v1078_v57  ;;  %v1047_v58 = vsel %vm919_vm4, %v773_v46, %v983_v53  ;;  %v683_v59 = vpop.f32.mrf.mxu2  ;;  %v1359_v46 = vld [vmem:[%s2527_s0 + $0xf8] sm:$0xf0] }
  0xee   :  { %v1111_v61 = vpack.c.bf16 %v1047_v58, %v1047_v58  ;;  %v684_v62 = vadd.f32 %v1959_v56, %v683_v59  ;;  %v606_v63 = vpop.f32.mrf.mxu0  ;;  %v1362_v50 = vor.u32 %v1605_v45, %v1359_v46 }
  0xef   :  { %1207 = vst.msk [vmem:[%s2529_s3 + $0xa0] sm:$0xf] %vm1166_vm2, %v1142_v35  ;;  %v607_v1 = vadd.f32 %v1959_v56, %v606_v63 }
  0xf0   :  { %1176 = vst.msk [vmem:[%s2529_s3 + $0x24] sm:$0xf] %vm1166_vm2, %v1111_v61  ;;  %v853_v4 = vadd.f32 %v2124_v54, %v684_v62  ;;  %v1490_v54 = vor.u32 %v1637_v6, %v1487_v7 }
  0xf1   :  { %v776_v8 = vadd.f32 %v775_v36, %v607_v1  ;;  %645 = vmatmul.bf16.gmra.mxu0 %v1342_v60  ;;  %v1357_v1 = vld [vmem:[%s2527_s0 + $0xf0] sm:$0xf] }
  0xf2   :  { %vm951_vm5 = vcmp.gt.f32.partialorder %v853_v4, 0.0  ;;  %v1015_v11 = vmul.f32 0.2, %v853_v4  ;;  %725 = vmatmul.bf16.gmra.mxu2 %v1470_v0  ;;  %v2228_v13 = vpop.f32.mrf.mxu3 }
  0xf3   :  { %vm920_vm6 = vcmp.gt.f32.partialorder %v776_v8, 0.0  ;;  %v984_v14 = vmul.f32 0.2, %v776_v8  ;;  %v780_v5 = vpop.f32.mrf.mxu1 }
  0xf4   :  { %v1079_v15 = vsel %vm951_vm5, %v853_v4, %v1015_v11  ;;  %v1485_v4 = vld [vmem:[%s2527_s0 + $0x1f0] sm:$0xf] }
  0xf5   :  { %v1143_v16 = vpack.c.bf16 %v1079_v15, %v1079_v15  ;;  %v1048_v17 = vsel %vm920_vm6, %v776_v8, %v984_v14  ;;  %v686_v19 = vpop.f32.mrf.mxu2  ;;  %v1638_v8 = vld [vmem:[%s2527_s0 + $0x1f4] sm:$0xf0] }
  0xf6   :  { %v1112_v20 = vpack.c.bf16 %v1048_v17, %v1048_v17  ;;  %v687_v21 = vadd.f32 %v1959_v56, %v686_v19  ;;  %1557 = vmatmul.msk.bf16.gmra.mxu1 %vm475_vm0, %v1354_v51  ;;  %v608_v22 = vpop.f32.mrf.mxu0  ;;  %v1486_v19 = vor.u32 %v1638_v8, %v1485_v4 }
  0xf7   :  { %1208 = vst.msk [vmem:[%s2529_s3 + $0xa4] sm:$0xf] %vm1166_vm2, %v1143_v16  ;;  %v609_v24 = vadd.f32 %v1959_v56, %v608_v22  ;;  %1574 = vmatmul.msk.bf16.gmra.mxu3 %vm475_vm0, %v1490_v54  ;;  %v1358_v54 = vor.u32 %v1606_v2, %v1357_v1  ;;  %v1367_v22 = vld [vmem:[%s2527_s0 + $0x108] sm:$0xf0] }
  0xf8   :  { %1177 = vst.msk [vmem:[%s2529_s3 + $0x28] sm:$0xf] %vm1166_vm2, %v1112_v20  ;;  %v856_v25 = vadd.f32 %v2148_v9, %v687_v21  ;;  %v1607_v21 = vld [vmem:[%s2527_s0 + $0x104] sm:$0xf] }
  0xf9   :  { %v778_v26 = vadd.f32 %v777_v31, %v609_v24  ;;  %v1370_v27 = vor.u32 %v1607_v21, %v1367_v22 }
  0xfa   :  { %vm952_vm7 = vcmp.gt.f32.partialorder %v856_v25, 0.0  ;;  %v1016_v29 = vmul.f32 0.2, %v856_v25  ;;  %v2252_v32 = vpop.f32.mrf.mxu3 }
  0xfb   :  { %vm921_vm8 = vcmp.gt.f32.partialorder %v778_v26, 0.0  ;;  %v985_v18 = vmul.f32 0.2, %v778_v26  ;;  %v782_v9 = vpop.f32.mrf.mxu1 }
  0xfc   :  { %v1080_v36 = vsel %vm952_vm7, %v856_v25, %v1016_v29 }
  0xfd   :  { %v1144_v12 = vpack.c.bf16 %v1080_v36, %v1080_v36  ;;  %v1049_v37 = vsel %vm921_vm8, %v778_v26, %v985_v18  ;;  %v688_v38 = vpop.f32.mrf.mxu2 }
  0xfe   :  { %v1113_v40 = vpack.c.bf16 %v1049_v37, %v1049_v37  ;;  %v689_v41 = vadd.f32 %v1959_v56, %v688_v38  ;;  %v611_v42 = vpop.f32.mrf.mxu0 }
  0xff   :  { %1209 = vst.msk [vmem:[%s2529_s3 + $0xa8] sm:$0xf] %vm1166_vm2, %v1144_v12  ;;  %v612_v44 = vadd.f32 %v1959_v56, %v611_v42 }
 0x100   :  { %1178 = vst.msk [vmem:[%s2529_s3 + $0x2c] sm:$0xf] %vm1166_vm2, %v1113_v40  ;;  %v858_v47 = vadd.f32 %v2176_v33, %v689_v41 }
 0x101   :  { %v781_v48 = vadd.f32 %v780_v5, %v612_v44  ;;  %650 = vmatmul.bf16.gmra.mxu0 %v1350_v39 }
 0x102   :  { %vm953_vm9 = vcmp.gt.f32.partialorder %v858_v47, 0.0  ;;  %v1017_v49 = vmul.f32 0.2, %v858_v47  ;;  %730 = vmatmul.bf16.gmra.mxu2 %v1478_v43  ;;  %v2274_v53 = vpop.f32.mrf.mxu3 }
 0x103   :  { %vm922_vm10 = vcmp.gt.f32.partialorder %v781_v48, 0.0  ;;  %v986_v31 = vmul.f32 0.2, %v781_v48  ;;  %v785_v55 = vpop.f32.mrf.mxu1 }
 0x104   :  { %v1081_v57 = vsel %vm953_vm9, %v858_v47, %v1017_v49 }
 0x105   :  { %v1145_v35 = vpack.c.bf16 %v1081_v57, %v1081_v57  ;;  %v1050_v58 = vsel %vm922_vm10, %v781_v48, %v986_v31  ;;  %v691_v59 = vpop.f32.mrf.mxu2 }
 0x106   :  { %v1114_v60 = vpack.c.bf16 %v1050_v58, %v1050_v58  ;;  %v692_v61 = vadd.f32 %v1959_v56, %v691_v59  ;;  %1558 = vmatmul.msk.bf16.gmra.mxu1 %vm475_vm0, %v1362_v50  ;;  %v613_v33 = vpop.f32.mrf.mxu0 }
 0x107   :  { %1210 = vst.msk [vmem:[%s2529_s3 + $0xac] sm:$0xf] %vm1166_vm2, %v1145_v35  ;;  %v614_v62 = vadd.f32 %v1959_v56, %v613_v33 }
 0x108   :  { %1179 = vst.msk [vmem:[%s2529_s3 + $0x30] sm:$0xf] %vm1166_vm2, %v1114_v60  ;;  %v861_v63 = vadd.f32 %v2200_v52, %v692_v61 }
 0x109   :  { %v783_v0 = vadd.f32 %v782_v9, %v614_v62 }
 0x10a   :  { %vm954_vm11 = vcmp.gt.f32.partialorder %v861_v63, 0.0  ;;  %v1018_v3 = vmul.f32 0.2, %v861_v63  ;;  %v2297_v6 = vpop.f32.mrf.mxu3 }
 0x10b   :  { %vm923_vm12 = vcmp.gt.f32.partialorder %v783_v0, 0.0  ;;  %v987_v7 = vmul.f32 0.2, %v783_v0  ;;  %v787_v52 = vpop.f32.mrf.mxu1 }
 0x10c   :  { %v1082_v11 = vsel %vm954_vm11, %v861_v63, %v1018_v3 }
 0x10d   :  { %v1146_v51 = vpack.c.bf16 %v1082_v11, %v1082_v11  ;;  %v1051_v14 = vsel %vm923_vm12, %v783_v0, %v987_v7  ;;  %v693_v5 = vpop.f32.mrf.mxu2 }
 0x10e   :  { %v1115_v15 = vpack.c.bf16 %v1051_v14, %v1051_v14  ;;  %v694_v16 = vadd.f32 %v1959_v56, %v693_v5  ;;  %v616_v17 = vpop.f32.mrf.mxu0 }
 0x10f   :  { %1211 = vst.msk [vmem:[%s2529_s3 + $0xb0] sm:$0xf] %vm1166_vm2, %v1146_v51  ;;  %v617_v20 = vadd.f32 %v1959_v56, %v616_v17 }
 0x110   :  { %1180 = vst.msk [vmem:[%s2529_s3 + $0x34] sm:$0xf] %vm1166_vm2, %v1115_v15  ;;  %v863_v24 = vadd.f32 %v2228_v13, %v694_v16 }
 0x111   :  { %v786_v25 = vadd.f32 %v785_v55, %v617_v20  ;;  %655 = vmatmul.bf16.gmra.mxu0 %v1358_v54 }
 0x112   :  { %vm955_vm13 = vcmp.gt.f32.partialorder %v863_v24, 0.0  ;;  %v1019_v26 = vmul.f32 0.2, %v863_v24  ;;  %735 = vmatmul.bf16.gmra.mxu2 %v1486_v19  ;;  %v2319_v30 = vpop.f32.mrf.mxu3 }
 0x113   :  { %vm924_vm14 = vcmp.gt.f32.partialorder %v786_v25, 0.0  ;;  %v988_v28 = vmul.f32 0.2, %v786_v25  ;;  %v790_v29 = vpop.f32.mrf.mxu1 }
 0x114   :  { %v1083_v18 = vsel %vm955_vm13, %v863_v24, %v1019_v26 }
 0x115   :  { %v1147_v9 = vpack.c.bf16 %v1083_v18, %v1083_v18  ;;  %v1052_v34 = vsel %vm924_vm14, %v786_v25, %v988_v28  ;;  %v696_v36 = vpop.f32.mrf.mxu2 }
 0x116   :  { %v1116_v12 = vpack.c.bf16 %v1052_v34, %v1052_v34  ;;  %v697_v37 = vadd.f32 %v1959_v56, %v696_v36  ;;  %1559 = vmatmul.msk.bf16.gmra.mxu1 %vm475_vm0, %v1370_v27  ;;  %v618_v13 = vpop.f32.mrf.mxu0 }
 0x117   :  { %1212 = vst.msk [vmem:[%s2529_s3 + $0xb4] sm:$0xf] %vm1166_vm2, %v1147_v9  ;;  %v619_v38 = vadd.f32 %v1959_v56, %v618_v13 }
 0x118   :  { %1181 = vst.msk [vmem:[%s2529_s3 + $0x38] sm:$0xf] %vm1166_vm2, %v1116_v12  ;;  %v866_v39 = vadd.f32 %v2252_v32, %v697_v37 }
 0x119   :  { %v788_v40 = vadd.f32 %v787_v52, %v619_v38 }
 0x11a   :  { %vm956_vm15 = vcmp.gt.f32.partialorder %v866_v39, 0.0  ;;  %v1020_v41 = vmul.f32 0.2, %v866_v39  ;;  %v875_v48 = vpop.f32.mrf.mxu3 }
 0x11b   :  { %vm925_vm1 = vcmp.gt.f32.partialorder %v788_v40, 0.0  ;;  %v989_v42 = vmul.f32 0.2, %v788_v40  ;;  %v792_v43 = vpop.f32.mrf.mxu1 }
 0x11c   :  { %v1084_v44 = vsel %vm956_vm15, %v866_v39, %v1020_v41 }
 0x11d   :  { %v1148_v45 = vpack.c.bf16 %v1084_v44, %v1084_v44  ;;  %v1053_v46 = vsel %vm925_vm1, %v788_v40, %v989_v42  ;;  %v698_v47 = vpop.f32.mrf.mxu2 }
 0x11e   :  { %v1117_v49 = vpack.c.bf16 %v1053_v46, %v1053_v46  ;;  %v699_v50 = vadd.f32 %v1959_v56, %v698_v47  ;;  %v621_v31 = vpop.f32.mrf.mxu0 }
 0x11f   :  { %1213 = vst.msk [vmem:[%s2529_s3 + $0xb8] sm:$0xf] %vm1166_vm2, %v1148_v45  ;;  %v622_v32 = vadd.f32 %v1959_v56, %v621_v31 }
 0x120   :  { %1182 = vst.msk [vmem:[%s2529_s3 + $0x3c] sm:$0xf] %vm1166_vm2, %v1117_v49  ;;  %v868_v55 = vadd.f32 %v2274_v53, %v699_v50 }
 0x121   :  { %v791_v57 = vadd.f32 %v790_v29, %v622_v32 }
 0x122   :  { %vm957_vm0 = vcmp.gt.f32.partialorder %v868_v55, 0.0  ;;  %v1021_v35 = vmul.f32 0.2, %v868_v55  ;;  %v877_v2 = vpop.f32.mrf.mxu3 }
 0x123   :  { %vm926_vm3 = vcmp.gt.f32.partialorder %v791_v57, 0.0  ;;  %v990_v58 = vmul.f32 0.2, %v791_v57  ;;  %v795_v59 = vpop.f32.mrf.mxu1 }
 0x124   :  { %v1085_v60 = vsel %vm957_vm0, %v868_v55, %v1021_v35 }
 0x125   :  { %v1149_v61 = vpack.c.bf16 %v1085_v60, %v1085_v60  ;;  %v1054_v33 = vsel %vm926_vm3, %v791_v57, %v990_v58  ;;  %v701_v62 = vpop.f32.mrf.mxu2 }
 0x126   :  { %v1118_v63 = vpack.c.bf16 %v1054_v33, %v1054_v33  ;;  %v702_v0 = vadd.f32 %v1959_v56, %v701_v62  ;;  %v623_v1 = vpop.f32.mrf.mxu0 }
 0x127   :  { %1214 = vst.msk [vmem:[%s2529_s3 + $0xbc] sm:$0xf] %vm1166_vm2, %v1149_v61  ;;  %v624_v53 = vadd.f32 %v1959_v56, %v623_v1 }
 0x128   :  { %1183 = vst.msk [vmem:[%s2529_s3 + $0x40] sm:$0xf] %vm1166_vm2, %v1118_v63  ;;  %v871_v3 = vadd.f32 %v2297_v6, %v702_v0 }
 0x129   :  { %v793_v4 = vadd.f32 %v792_v43, %v624_v53 }
 0x12a   :  { %vm958_vm4 = vcmp.gt.f32.partialorder %v871_v3, 0.0  ;;  %v1022_v7 = vmul.f32 0.2, %v871_v3  ;;  %v880_v20 = vpop.f32.mrf.mxu3 }
 0x12b   :  { %vm927_vm5 = vcmp.gt.f32.partialorder %v793_v4, 0.0  ;;  %v991_v52 = vmul.f32 0.2, %v793_v4  ;;  %v797_v8 = vpop.f32.mrf.mxu1 }
 0x12c   :  { %v1086_v11 = vsel %vm958_vm4, %v871_v3, %v1022_v7 }
 0x12d   :  { %v1150_v51 = vpack.c.bf16 %v1086_v11, %v1086_v11  ;;  %v1055_v14 = vsel %vm927_vm5, %v793_v4, %v991_v52  ;;  %v703_v5 = vpop.f32.mrf.mxu2 }
 0x12e   :  { %v1119_v54 = vpack.c.bf16 %v1055_v14, %v1055_v14  ;;  %v704_v15 = vadd.f32 %v1959_v56, %v703_v5  ;;  %v626_v16 = vpop.f32.mrf.mxu0 }
 0x12f   :  { %1215 = vst.msk [vmem:[%s2529_s3 + $0xc0] sm:$0xf] %vm1166_vm2, %v1150_v51  ;;  %v627_v6 = vadd.f32 %v1959_v56, %v626_v16 }
 0x130   :  { %1184 = vst.msk [vmem:[%s2529_s3 + $0x44] sm:$0xf] %vm1166_vm2, %v1119_v54  ;;  %v873_v17 = vadd.f32 %v2319_v30, %v704_v15 }
 0x131   :  { %v796_v19 = vadd.f32 %v795_v59, %v627_v6 }
 0x132   :  { %vm959_vm6 = vcmp.gt.f32.partialorder %v873_v17, 0.0  ;;  %v1023_v21 = vmul.f32 0.2, %v873_v17  ;;  %v882_v38 = vpop.f32.mrf.mxu3 }
 0x133   :  { %vm928_vm7 = vcmp.gt.f32.partialorder %v796_v19, 0.0  ;;  %v992_v22 = vmul.f32 0.2, %v796_v19  ;;  %v800_v24 = vpop.f32.mrf.mxu1 }
 0x134   :  { %v1087_v25 = vsel %vm959_vm6, %v873_v17, %v1023_v21 }
 0x135   :  { %v1151_v26 = vpack.c.bf16 %v1087_v25, %v1087_v25  ;;  %v1056_v27 = vsel %vm928_vm7, %v796_v19, %v992_v22  ;;  %v706_v28 = vpop.f32.mrf.mxu2 }
 0x136   :  { %v1120_v29 = vpack.c.bf16 %v1056_v27, %v1056_v27  ;;  %v707_v18 = vadd.f32 %v1959_v56, %v706_v28  ;;  %v628_v9 = vpop.f32.mrf.mxu0 }
 0x137   :  { %1216 = vst.msk [vmem:[%s2529_s3 + $0xc4] sm:$0xf] %vm1166_vm2, %v1151_v26  ;;  %v629_v30 = vadd.f32 %v1959_v56, %v628_v9  ;;  %v2414_v26 = vld [vmem:[%s2528_s2] ss:$0 sm:$0xff] }
 0x138   :  { %1185 = vst.msk [vmem:[%s2529_s3 + $0x48] sm:$0xf] %vm1166_vm2, %v1120_v29  ;;  %v876_v34 = vadd.f32 %v875_v48, %v707_v18 }
 0x139   :  { %v798_v36 = vadd.f32 %v797_v8, %v629_v30 }
 0x13a   :  { %vm960_vm8 = vcmp.gt.f32.partialorder %v876_v34, 0.0  ;;  %v1024_v12 = vmul.f32 0.2, %v876_v34  ;;  %v885_v58 = vpop.f32.mrf.mxu3 }
 0x13b   :  { %vm929_vm9 = vcmp.gt.f32.partialorder %v798_v36, 0.0  ;;  %v993_v37 = vmul.f32 0.2, %v798_v36  ;;  %v802_v13 = vpop.f32.mrf.mxu1 }
 0x13c   :  { %v1088_v39 = vsel %vm960_vm8, %v876_v34, %v1024_v12 }
 0x13d   :  { %v1152_v40 = vpack.c.bf16 %v1088_v39, %v1088_v39  ;;  %v1057_v41 = vsel %vm929_vm9, %v798_v36, %v993_v37  ;;  %v708_v42 = vpop.f32.mrf.mxu2 }
 0x13e   :  { %v1121_v43 = vpack.c.bf16 %v1057_v41, %v1057_v41  ;;  %v709_v44 = vadd.f32 %v1959_v56, %v708_v42  ;;  %v631_v45 = vpop.f32.mrf.mxu0 }
 0x13f   :  { %1217 = vst.msk [vmem:[%s2529_s3 + $0xc8] sm:$0xf] %vm1166_vm2, %v1152_v40  ;;  %v632_v46 = vadd.f32 %v1959_v56, %v631_v45 }
 0x140   :  { %1186 = vst.msk [vmem:[%s2529_s3 + $0x4c] sm:$0xf] %vm1166_vm2, %v1121_v43  ;;  %v878_v47 = vadd.f32 %v877_v2, %v709_v44 }
 0x141   :  { %v801_v48 = vadd.f32 %v800_v24, %v632_v46 }
 0x142   :  { %vm961_vm10 = vcmp.gt.f32.partialorder %v878_v47, 0.0  ;;  %v1025_v49 = vmul.f32 0.2, %v878_v47  ;;  %v887_v14 = vpop.f32.mrf.mxu3 }
 0x143   :  { %vm930_vm11 = vcmp.gt.f32.partialorder %v801_v48, 0.0  ;;  %v994_v50 = vmul.f32 0.2, %v801_v48  ;;  %v805_v31 = vpop.f32.mrf.mxu1 }
 0x144   :  { %v1089_v32 = vsel %vm961_vm10, %v878_v47, %v1025_v49 }
 0x145   :  { %v1153_v55 = vpack.c.bf16 %v1089_v32, %v1089_v32  ;;  %v1058_v57 = vsel %vm930_vm11, %v801_v48, %v994_v50  ;;  %v711_v35 = vpop.f32.mrf.mxu2 }
 0x146   :  { %v1122_v59 = vpack.c.bf16 %v1058_v57, %v1058_v57  ;;  %v712_v60 = vadd.f32 %v1959_v56, %v711_v35  ;;  %v633_v61 = vpop.f32.mrf.mxu0 }
 0x147   :  { %1218 = vst.msk [vmem:[%s2529_s3 + $0xcc] sm:$0xf] %vm1166_vm2, %v1153_v55  ;;  %v634_v33 = vadd.f32 %v1959_v56, %v633_v61 }
 0x148   :  { %1187 = vst.msk [vmem:[%s2529_s3 + $0x50] sm:$0xf] %vm1166_vm2, %v1122_v59  ;;  %v881_v62 = vadd.f32 %v880_v20, %v712_v60 }
 0x149   :  { %v803_v63 = vadd.f32 %v802_v13, %v634_v33 }
 0x14a   :  { %vm962_vm12 = vcmp.gt.f32.partialorder %v881_v62, 0.0  ;;  %v1026_v0 = vmul.f32 0.2, %v881_v62  ;;  %v890_v29 = vpop.f32.mrf.mxu3 }
 0x14b   :  { %vm931_vm13 = vcmp.gt.f32.partialorder %v803_v63, 0.0  ;;  %v995_v1 = vmul.f32 0.2, %v803_v63  ;;  %v807_v53 = vpop.f32.mrf.mxu1 }
 0x14c   :  { %v1090_v2 = vsel %vm962_vm12, %v881_v62, %v1026_v0 }
 0x14d   :  { %v1154_v3 = vpack.c.bf16 %v1090_v2, %v1090_v2  ;;  %v1059_v4 = vsel %vm931_vm13, %v803_v63, %v995_v1  ;;  %v713_v7 = vpop.f32.mrf.mxu2 }
 0x14e   :  { %v1123_v52 = vpack.c.bf16 %v1059_v4, %v1059_v4  ;;  %v714_v8 = vadd.f32 %v1959_v56, %v713_v7  ;;  %v636_v11 = vpop.f32.mrf.mxu0 }
 0x14f   :  { %1219 = vst.msk [vmem:[%s2529_s3 + $0xd0] sm:$0xf] %vm1166_vm2, %v1154_v3  ;;  %v637_v51 = vadd.f32 %v1959_v56, %v636_v11 }
 0x150   :  { %1188 = vst.msk [vmem:[%s2529_s3 + $0x54] sm:$0xf] %vm1166_vm2, %v1123_v52  ;;  %v883_v5 = vadd.f32 %v882_v38, %v714_v8 }
 0x151   :  { %v806_v54 = vadd.f32 %v805_v31, %v637_v51 }
 0x152   :  { %vm963_vm14 = vcmp.gt.f32.partialorder %v883_v5, 0.0  ;;  %v1027_v15 = vmul.f32 0.2, %v883_v5  ;;  %v892_v46 = vpop.f32.mrf.mxu3 }
 0x153   :  { %vm932_vm15 = vcmp.gt.f32.partialorder %v806_v54, 0.0  ;;  %v996_v16 = vmul.f32 0.2, %v806_v54  ;;  %v810_v6 = vpop.f32.mrf.mxu1 }
 0x154   :  { %v1091_v17 = vsel %vm963_vm14, %v883_v5, %v1027_v15 }
 0x155   :  { %v1155_v19 = vpack.c.bf16 %v1091_v17, %v1091_v17  ;;  %v1060_v20 = vsel %vm932_vm15, %v806_v54, %v996_v16  ;;  %v716_v21 = vpop.f32.mrf.mxu2 }
 0x156   :  { %v1124_v22 = vpack.c.bf16 %v1060_v20, %v1060_v20  ;;  %v717_v24 = vadd.f32 %v1959_v56, %v716_v21  ;;  %v638_v25 = vpop.f32.mrf.mxu0 }
 0x157   :  { %1220 = vst.msk [vmem:[%s2529_s3 + $0xd4] sm:$0xf] %vm1166_vm2, %v1155_v19  ;;  %v639_v27 = vadd.f32 %v2414_v26, %v638_v25 }
 0x158   :  { %1189 = vst.msk [vmem:[%s2529_s3 + $0x58] sm:$0xf] %vm1166_vm2, %v1124_v22  ;;  %v886_v28 = vadd.f32 %v885_v58, %v717_v24 }
 0x159   :  { %v808_v56 = vadd.f32 %v807_v53, %v639_v27 }
 0x15a   :  { %vm964_vm1 = vcmp.gt.f32.partialorder %v886_v28, 0.0  ;;  %v1028_v18 = vmul.f32 0.2, %v886_v28  ;;  %v895_v1 = vpop.f32.mrf.mxu3 }
 0x15b   :  { %vm933_vm0 = vcmp.gt.f32.partialorder %v808_v56, 0.0  ;;  %v997_v9 = vmul.f32 0.2, %v808_v56  ;;  %v812_v30 = vpop.f32.mrf.mxu1 }
 0x15c   :  { %v1092_v34 = vsel %vm964_vm1, %v886_v28, %v1028_v18 }
 0x15d   :  { %v1156_v36 = vpack.c.bf16 %v1092_v34, %v1092_v34  ;;  %v1061_v12 = vsel %vm933_vm0, %v808_v56, %v997_v9  ;;  %v718_v37 = vpop.f32.mrf.mxu2 }
 0x15e   :  { %v1125_v13 = vpack.c.bf16 %v1061_v12, %v1061_v12  ;;  %v719_v38 = vadd.f32 %v2414_v26, %v718_v37  ;;  %v641_v39 = vpop.f32.mrf.mxu0 }
 0x15f   :  { %1221 = vst.msk [vmem:[%s2529_s3 + $0xd8] sm:$0xf] %vm1166_vm2, %v1156_v36  ;;  %v642_v40 = vadd.f32 %v2414_v26, %v641_v39 }
 0x160   :  { %1190 = vst.msk [vmem:[%s2529_s3 + $0x5c] sm:$0xf] %vm1166_vm2, %v1125_v13  ;;  %v888_v41 = vadd.f32 %v887_v14, %v719_v38 }
 0x161   :  { %v811_v42 = vadd.f32 %v810_v6, %v642_v40 }
 0x162   :  { %vm965_vm3 = vcmp.gt.f32.partialorder %v888_v41, 0.0  ;;  %v1029_v43 = vmul.f32 0.2, %v888_v41  ;;  %v897_v20 = vpop.f32.mrf.mxu3 }
 0x163   :  { %vm934_vm4 = vcmp.gt.f32.partialorder %v811_v42, 0.0  ;;  %v998_v44 = vmul.f32 0.2, %v811_v42  ;;  %v815_v45 = vpop.f32.mrf.mxu1 }
 0x164   :  { %v1093_v47 = vsel %vm965_vm3, %v888_v41, %v1029_v43 }
 0x165   :  { %v1157_v48 = vpack.c.bf16 %v1093_v47, %v1093_v47  ;;  %v1062_v49 = vsel %vm934_vm4, %v811_v42, %v998_v44  ;;  %v721_v50 = vpop.f32.mrf.mxu2 }
 0x166   :  { %v1126_v31 = vpack.c.bf16 %v1062_v49, %v1062_v49  ;;  %v722_v32 = vadd.f32 %v2414_v26, %v721_v50  ;;  %v643_v55 = vpop.f32.mrf.mxu0 }
 0x167   :  { %1222 = vst.msk [vmem:[%s2529_s3 + $0xdc] sm:$0xf] %vm1166_vm2, %v1157_v48  ;;  %v644_v57 = vadd.f32 %v2414_v26, %v643_v55 }
 0x168   :  { %1191 = vst.msk [vmem:[%s2529_s3 + $0x60] sm:$0xf] %vm1166_vm2, %v1126_v31  ;;  %v891_v35 = vadd.f32 %v890_v29, %v722_v32 }
 0x169   :  { %v813_v58 = vadd.f32 %v812_v30, %v644_v57 }
 0x16a   :  { %vm966_vm5 = vcmp.gt.f32.partialorder %v891_v35, 0.0  ;;  %v1030_v59 = vmul.f32 0.2, %v891_v35  ;;  %v900_v13 = vpop.f32.mrf.mxu3 }
 0x16b   :  { %vm935_vm6 = vcmp.gt.f32.partialorder %v813_v58, 0.0  ;;  %v999_v60 = vmul.f32 0.2, %v813_v58  ;;  %v817_v61 = vpop.f32.mrf.mxu1 }
 0x16c   :  { %v1094_v33 = vsel %vm966_vm5, %v891_v35, %v1030_v59 }
 0x16d   :  { %v1158_v62 = vpack.c.bf16 %v1094_v33, %v1094_v33  ;;  %v1063_v63 = vsel %vm935_vm6, %v813_v58, %v999_v60  ;;  %v723_v0 = vpop.f32.mrf.mxu2 }
 0x16e   :  { %v1127_v53 = vpack.c.bf16 %v1063_v63, %v1063_v63  ;;  %v724_v2 = vadd.f32 %v2414_v26, %v723_v0  ;;  %v646_v3 = vpop.f32.mrf.mxu0 }
 0x16f   :  { %1223 = vst.msk [vmem:[%s2529_s3 + $0xe0] sm:$0xf] %vm1166_vm2, %v1158_v62  ;;  %v647_v4 = vadd.f32 %v2414_v26, %v646_v3 }
 0x170   :  { %1192 = vst.msk [vmem:[%s2529_s3 + $0x64] sm:$0xf] %vm1166_vm2, %v1127_v53  ;;  %v893_v7 = vadd.f32 %v892_v46, %v724_v2  ;;  %v662_v53 = vadd.f32 %v2414_v26, %v1982_v10 }
 0x171   :  { %v816_v52 = vadd.f32 %v815_v45, %v647_v4 }
 0x172   :  { %vm967_vm7 = vcmp.gt.f32.partialorder %v893_v7, 0.0  ;;  %v1031_v8 = vmul.f32 0.2, %v893_v7  ;;  %v902_v55 = vpop.f32.mrf.mxu3 }
 0x173   :  { %vm936_vm8 = vcmp.gt.f32.partialorder %v816_v52, 0.0  ;;  %v1000_v11 = vmul.f32 0.2, %v816_v52  ;;  %v820_v51 = vpop.f32.mrf.mxu1 }
 0x174   :  { %v1095_v14 = vsel %vm967_vm7, %v893_v7, %v1031_v8 }
 0x175   :  { %v1159_v5 = vpack.c.bf16 %v1095_v14, %v1095_v14  ;;  %v1064_v54 = vsel %vm936_vm8, %v816_v52, %v1000_v11  ;;  %v726_v15 = vpop.f32.mrf.mxu2 }
 0x176   :  { %v1128_v16 = vpack.c.bf16 %v1064_v54, %v1064_v54  ;;  %v727_v6 = vadd.f32 %v2414_v26, %v726_v15  ;;  %v648_v17 = vpop.f32.mrf.mxu0 }
 0x177   :  { %1224 = vst.msk [vmem:[%s2529_s3 + $0xe4] sm:$0xf] %vm1166_vm2, %v1159_v5  ;;  %v649_v19 = vadd.f32 %v2414_v26, %v648_v17 }
 0x178   :  { %1193 = vst.msk [vmem:[%s2529_s3 + $0x68] sm:$0xf] %vm1166_vm2, %v1128_v16  ;;  %v896_v21 = vadd.f32 %v895_v1, %v727_v6 }
 0x179   :  { %v818_v22 = vadd.f32 %v817_v61, %v649_v19 }
 0x17a   :  { %vm968_vm9 = vcmp.gt.f32.partialorder %v896_v21, 0.0  ;;  %v1032_v24 = vmul.f32 0.2, %v896_v21 }
 0x17b   :  { %vm937_vm10 = vcmp.gt.f32.partialorder %v818_v22, 0.0  ;;  %v1001_v25 = vmul.f32 0.2, %v818_v22  ;;  %v822_v27 = vpop.f32.mrf.mxu1 }
 0x17c   :  { %v1096_v28 = vsel %vm968_vm9, %v896_v21, %v1032_v24  ;;  %v664_v21 = vadd.f32 %v2414_v26, %v2005_v23 }
 0x17d   :  { %v1160_v56 = vpack.c.bf16 %v1096_v28, %v1096_v28  ;;  %v1065_v29 = vsel %vm937_vm10, %v818_v22, %v1001_v25  ;;  %v728_v18 = vpop.f32.mrf.mxu2 }
 0x17e   :  { %v1129_v9 = vpack.c.bf16 %v1065_v29, %v1065_v29  ;;  %v729_v30 = vadd.f32 %v2414_v26, %v728_v18  ;;  %v651_v34 = vpop.f32.mrf.mxu0 }
 0x17f   :  { %1225 = vst.msk [vmem:[%s2529_s3 + $0xe8] sm:$0xf] %vm1166_vm2, %v1160_v56  ;;  %v652_v36 = vadd.f32 %v2414_v26, %v651_v34 }
 0x180   :  { %1194 = vst.msk [vmem:[%s2529_s3 + $0x6c] sm:$0xf] %vm1166_vm2, %v1129_v9  ;;  %v898_v12 = vadd.f32 %v897_v20, %v729_v30 }
 0x181   :  { %v821_v37 = vadd.f32 %v820_v51, %v652_v36  ;;  %v905_v51 = vpop.f32.mrf.mxu3 }
 0x182   :  { %vm969_vm11 = vcmp.gt.f32.partialorder %v898_v12, 0.0  ;;  %v1033_v38 = vmul.f32 0.2, %v898_v12 }
 0x183   :  { %vm938_vm12 = vcmp.gt.f32.partialorder %v821_v37, 0.0  ;;  %v1002_v39 = vmul.f32 0.2, %v821_v37  ;;  %v825_v40 = vpop.f32.mrf.mxu1 }
 0x184   :  { %v1097_v41 = vsel %vm969_vm11, %v898_v12, %v1033_v38 }
 0x185   :  { %v1161_v42 = vpack.c.bf16 %v1097_v41, %v1097_v41  ;;  %v1066_v43 = vsel %vm938_vm12, %v821_v37, %v1002_v39  ;;  %v731_v44 = vpop.f32.mrf.mxu2 }
 0x186   :  { %v1130_v45 = vpack.c.bf16 %v1066_v43, %v1066_v43  ;;  %v732_v46 = vadd.f32 %v2414_v26, %v731_v44  ;;  %v653_v47 = vpop.f32.mrf.mxu0 }
 0x187   :  { %1226 = vst.msk [vmem:[%s2529_s3 + $0xec] sm:$0xf] %vm1166_vm2, %v1161_v42  ;;  %v654_v48 = vadd.f32 %v2414_v26, %v653_v47 }
 0x188   :  { %1195 = vst.msk [vmem:[%s2529_s3 + $0x70] sm:$0xf] %vm1166_vm2, %v1130_v45  ;;  %v901_v49 = vadd.f32 %v900_v13, %v732_v46 }
 0x189   :  { %v823_v50 = vadd.f32 %v822_v27, %v654_v48  ;;  %v907_v34 = vpop.f32.mrf.mxu3 }
 0x18a   :  { %vm970_vm13 = vcmp.gt.f32.partialorder %v901_v49, 0.0  ;;  %v1034_v31 = vmul.f32 0.2, %v901_v49 }
 0x18b   :  { %vm939_vm14 = vcmp.gt.f32.partialorder %v823_v50, 0.0  ;;  %v1003_v32 = vmul.f32 0.2, %v823_v50  ;;  %v827_v57 = vpop.f32.mrf.mxu1 }
 0x18c   :  { %v1098_v35 = vsel %vm970_vm13, %v901_v49, %v1034_v31 }
 0x18d   :  { %v1162_v58 = vpack.c.bf16 %v1098_v35, %v1098_v35  ;;  %v1067_v59 = vsel %vm939_vm14, %v823_v50, %v1003_v32  ;;  %v733_v60 = vpop.f32.mrf.mxu2 }
 0x18e   :  { %v1131_v61 = vpack.c.bf16 %v1067_v59, %v1067_v59  ;;  %v734_v33 = vadd.f32 %v2414_v26, %v733_v60  ;;  %v656_v62 = vpop.f32.mrf.mxu0 }
 0x18f   :  { %1227 = vst.msk [vmem:[%s2529_s3 + $0xf0] sm:$0xf] %vm1166_vm2, %v1162_v58  ;;  %v657_v63 = vadd.f32 %v2414_v26, %v656_v62 }
 0x190   :  { %1196 = vst.msk [vmem:[%s2529_s3 + $0x74] sm:$0xf] %vm1166_vm2, %v1131_v61  ;;  %v903_v0 = vadd.f32 %v902_v55, %v734_v33 }
 0x191   :  { %v826_v1 = vadd.f32 %v825_v40, %v657_v63 }
 0x192   :  { %vm971_vm15 = vcmp.gt.f32.partialorder %v903_v0, 0.0  ;;  %v1035_v2 = vmul.f32 0.2, %v903_v0 }
 0x193   :  { %vm940_vm1 = vcmp.gt.f32.partialorder %v826_v1, 0.0  ;;  %v1004_v3 = vmul.f32 0.2, %v826_v1  ;;  %v830_v4 = vpop.f32.mrf.mxu1 }
 0x194   :  { %v1099_v7 = vsel %vm971_vm15, %v903_v0, %v1035_v2  ;;  %v831_v52 = vadd.f32 %v830_v4, %v662_v53 }
 0x195   :  { %v1163_v8 = vpack.c.bf16 %v1099_v7, %v1099_v7  ;;  %v1068_v11 = vsel %vm940_vm1, %v826_v1, %v1004_v3  ;;  %v736_v14 = vpop.f32.mrf.mxu2 }
 0x196   :  { %v1132_v5 = vpack.c.bf16 %v1068_v11, %v1068_v11  ;;  %vm942_vm0 = vcmp.gt.f32.partialorder %v831_v52, 0.0  ;;  %v1006_v54 = vmul.f32 0.2, %v831_v52  ;;  %v737_v15 = vadd.f32 %v2414_v26, %v736_v14  ;;  %v658_v16 = vpop.f32.mrf.mxu0 }
 0x197   :  { %1228 = vst.msk [vmem:[%s2529_s3 + $0xf4] sm:$0xf] %vm1166_vm2, %v1163_v8  ;;  %v659_v10 = vadd.f32 %v2414_v26, %v658_v16 }
 0x198   :  { %1197 = vst.msk [vmem:[%s2529_s3 + $0x78] sm:$0xf] %vm1166_vm2, %v1132_v5  ;;  %v1070_v6 = vsel %vm942_vm0, %v831_v52, %v1006_v54  ;;  %v906_v17 = vadd.f32 %v905_v51, %v737_v15 }
 0x199   :  { %v1134_v19 = vpack.c.bf16 %v1070_v6, %v1070_v6  ;;  %v828_v20 = vadd.f32 %v827_v57, %v659_v10 }
 0x19a   :  { %vm972_vm3 = vcmp.gt.f32.partialorder %v906_v17, 0.0  ;;  %v1036_v22 = vmul.f32 0.2, %v906_v17 }
 0x19b   :  { %1199 = vst.msk [vmem:[%s2529_s3 + $0x80] sm:$0xf] %vm1166_vm2, %v1134_v19  ;;  %vm941_vm4 = vcmp.gt.f32.partialorder %v828_v20, 0.0  ;;  %v1005_v24 = vmul.f32 0.2, %v828_v20  ;;  %v832_v25 = vpop.f32.mrf.mxu1 }
 0x19c   :  { %v1100_v27 = vsel %vm972_vm3, %v906_v17, %v1036_v22  ;;  %v833_v28 = vadd.f32 %v832_v25, %v664_v21 }
 0x19d   :  { %v1164_v56 = vpack.c.bf16 %v1100_v27, %v1100_v27  ;;  %v1069_v29 = vsel %vm941_vm4, %v828_v20, %v1005_v24  ;;  %v738_v18 = vpop.f32.mrf.mxu2 }
 0x19e   :  { %v1133_v9 = vpack.c.bf16 %v1069_v29, %v1069_v29  ;;  %vm943_vm5 = vcmp.gt.f32.partialorder %v833_v28, 0.0  ;;  %v1007_v30 = vmul.f32 0.2, %v833_v28  ;;  %v739_v23 = vadd.f32 %v2414_v26, %v738_v18 }
 0x19f   :  { %1229 = vst.msk [vmem:[%s2529_s3 + $0xf8] sm:$0xf] %vm1166_vm2, %v1164_v56 }
 0x1a0   :  { %1198 = vst.msk [vmem:[%s2529_s3 + $0x7c] sm:$0xf] %vm1166_vm2, %v1133_v9  ;;  %v1071_v36 = vsel %vm943_vm5, %v833_v28, %v1007_v30  ;;  %v908_v12 = vadd.f32 %v907_v34, %v739_v23 }
 0x1a1   :  { %v1135_v37 = vpack.c.bf16 %v1071_v36, %v1071_v36 }
 0x1a2   :  { %vm973_vm6 = vcmp.gt.f32.partialorder %v908_v12, 0.0  ;;  %v1037_v13 = vmul.f32 0.2, %v908_v12 }
 0x1a3   :  { %1200 = vst.msk [vmem:[%s2529_s3 + $0x84] sm:$0xf] %vm1166_vm2, %v1135_v37 }
 0x1a4   :  { %v1101_v26 = vsel %vm973_vm6, %v908_v12, %v1037_v13 }
 0x1a5   :  { %v1165_v38 = vpack.c.bf16 %v1101_v26, %v1101_v26 }
 0x1a7   :  { %1230 = vst.msk [vmem:[%s2529_s3 + $0xfc] sm:$0xf] %vm1166_vm2, %v1165_v38 }

// kernel: discriminator_forward.5
= control target key start
LH: loop header
LB: loop body
LE: loop exit
PB: predicated region body
PF: predicated region fallthrough
CT: control target
= control target key end

     0   :  { %vm404_vm1 = vcmask 257024   ;;  %s851_s1 = inlined_call_operand.vmem [shape: bf16[256,32], index: 1, kind: input, shape index: {}]   ;;  %s852_s2 = inlined_call_operand.vmem [shape: f32[1,32], index: 2, kind: input, shape index: {}]   ;;  %s853_s0 = inlined_call_operand.vmem [shape: bf16[128,256], index: 0, kind: input, shape index: {}]   ;;  %s854_s3 = inlined_call_operand.vmem [shape: bf16[128,32], index: 3, kind: output, shape index: {}]  }
   0x1   :  { %v576_v0 = vld [vmem:[%s851_s1 + $0x38] sm:$0xff]  ;;  %v575_v2 = vld [vmem:[%s851_s1 + $0x30] sm:$0xff]  ;;  %v574_v4 = vld [vmem:[%s851_s1 + $0x28] sm:$0xff] }
   0x2   :  { %v584_v1 = vld [vmem:[%s851_s1 + $0x78] sm:$0xff]  ;;  %242 = vmatpush.bf16.msra.mxu0 %v576_v0  ;;  %585 = vmatpush.bf16.msra.mxu2 %v576_v0  ;;  %v583_v3 = vld [vmem:[%s851_s1 + $0x70] sm:$0xff]  ;;  %v582_v5 = vld [vmem:[%s851_s1 + $0x68] sm:$0xff] }
   0x3   :  { %291 = vmatpush.bf16.msra.mxu1 %v584_v1  ;;  %593 = vmatpush.bf16.msra.mxu3 %v584_v1  ;;  %v573_v6 = vld [vmem:[%s851_s1 + $0x20] sm:$0xff]  ;;  %v572_v8 = vld [vmem:[%s851_s1 + $0x18] sm:$0xff]  ;;  %v571_v10 = vld [vmem:[%s851_s1 + $0x10] sm:$0xff] }
   0x4   :  { %v581_v7 = vld [vmem:[%s851_s1 + $0x60] sm:$0xff]  ;;  %v580_v9 = vld [vmem:[%s851_s1 + $0x58] sm:$0xff]  ;;  %v579_v11 = vld [vmem:[%s851_s1 + $0x50] sm:$0xff] }
   0x5   :  { %v570_v12 = vld [vmem:[%s851_s1 + $0x8] sm:$0xff]  ;;  %v569_v14 = vld [vmem:[%s851_s1] sm:$0xff]  ;;  %v435_v28 = vld [vmem:[%s853_s0 + $0x10] sm:$0xf] }
   0x6   :  { %243 = vmatpush.bf16.msra.mxu0 %v575_v2  ;;  %586 = vmatpush.bf16.msra.mxu2 %v575_v2  ;;  %v578_v13 = vld [vmem:[%s851_s1 + $0x48] sm:$0xff]  ;;  %v577_v15 = vld [vmem:[%s851_s1 + $0x40] sm:$0xff]  ;;  %v556_v29 = vld [vmem:[%s853_s0 + $0x14] sm:$0xf0] }
   0x7   :  { %292 = vmatpush.bf16.msra.mxu1 %v583_v3  ;;  %594 = vmatpush.bf16.msra.mxu3 %v583_v3  ;;  %v427_v16 = vld [vmem:[%s853_s0] sm:$0xf]  ;;  %v554_v17 = vld [vmem:[%s853_s0 + $0x4] sm:$0xf0]  ;;  %v553_v20 = vld [vmem:[%s853_s0 + $0x4] sm:$0xf]  ;;  %v436_v36 = vor.u32 %v556_v29, %v435_v28 }
   0x8   :  { %v459_v18 = vld [vmem:[%s853_s0 + $0x40] sm:$0xf]  ;;  %v562_v19 = vld [vmem:[%s853_s0 + $0x44] sm:$0xf0]  ;;  %v429_v21 = vld [vmem:[%s853_s0 + $0x8] sm:$0xf0]  ;;  %v428_v24 = vor.u32 %v554_v17, %v427_v16 }
   0x9   :  { %v561_v22 = vld [vmem:[%s853_s0 + $0x44] sm:$0xf]  ;;  %v461_v23 = vld [vmem:[%s853_s0 + $0x48] sm:$0xf0]  ;;  %v460_v25 = vor.u32 %v562_v19, %v459_v18  ;;  %v432_v26 = vor.u32 %v553_v20, %v429_v21  ;;  %v467_v30 = vld [vmem:[%s853_s0 + $0x50] sm:$0xf] }
   0xa   :  { %244 = vmatpush.bf16.msra.mxu0 %v574_v4  ;;  %587 = vmatpush.bf16.msra.mxu2 %v574_v4  ;;  %v464_v27 = vor.u32 %v561_v22, %v461_v23  ;;  %v564_v31 = vld [vmem:[%s853_s0 + $0x54] sm:$0xf0]  ;;  %v555_v32 = vld [vmem:[%s853_s0 + $0x14] sm:$0xf]  ;;  %v437_v33 = vld [vmem:[%s853_s0 + $0x18] sm:$0xf0] }
   0xb   :  { %293 = vmatpush.bf16.msra.mxu1 %v582_v5  ;;  %595 = vmatpush.bf16.msra.mxu3 %v582_v5  ;;  %v563_v34 = vld [vmem:[%s853_s0 + $0x54] sm:$0xf]  ;;  %v469_v35 = vld [vmem:[%s853_s0 + $0x58] sm:$0xf0]  ;;  %v468_v37 = vor.u32 %v564_v31, %v467_v30  ;;  %v440_v38 = vor.u32 %v555_v32, %v437_v33  ;;  %v443_v40 = vld [vmem:[%s853_s0 + $0x20] sm:$0xf] }
   0xc   :  { %v472_v39 = vor.u32 %v563_v34, %v469_v35  ;;  %v558_v41 = vld [vmem:[%s853_s0 + $0x24] sm:$0xf0]  ;;  %v475_v42 = vld [vmem:[%s853_s0 + $0x60] sm:$0xf]  ;;  %v557_v44 = vld [vmem:[%s853_s0 + $0x24] sm:$0xf] }
   0xd   :  { %v566_v43 = vld [vmem:[%s853_s0 + $0x64] sm:$0xf0]  ;;  %v445_v45 = vld [vmem:[%s853_s0 + $0x28] sm:$0xf0]  ;;  %v565_v46 = vld [vmem:[%s853_s0 + $0x64] sm:$0xf]  ;;  %v444_v48 = vor.u32 %v558_v41, %v443_v40 }
   0xe   :  { %245 = vmatpush.bf16.msra.mxu0 %v573_v6  ;;  %588 = vmatpush.bf16.msra.mxu2 %v573_v6  ;;  %v477_v47 = vld [vmem:[%s853_s0 + $0x68] sm:$0xf0]  ;;  %v476_v49 = vor.u32 %v566_v43, %v475_v42  ;;  %v448_v50 = vor.u32 %v557_v44, %v445_v45  ;;  %v451_v52 = vld [vmem:[%s853_s0 + $0x30] sm:$0xf]  ;;  %v560_v53 = vld [vmem:[%s853_s0 + $0x34] sm:$0xf0] }
   0xf   :  { %294 = vmatpush.bf16.msra.mxu1 %v581_v7  ;;  %596 = vmatpush.bf16.msra.mxu3 %v581_v7  ;;  %v480_v51 = vor.u32 %v565_v46, %v477_v47  ;;  %v483_v54 = vld [vmem:[%s853_s0 + $0x70] sm:$0xf]  ;;  %v568_v55 = vld [vmem:[%s853_s0 + $0x74] sm:$0xf0]  ;;  %v559_v56 = vld [vmem:[%s853_s0 + $0x34] sm:$0xf]  ;;  %v452_v60 = vor.u32 %v560_v53, %v451_v52 }
  0x10   :  { %v453_v57 = vld [vmem:[%s853_s0 + $0x38] sm:$0xf0]  ;;  %v567_v58 = vld [vmem:[%s853_s0 + $0x74] sm:$0xf]  ;;  %v484_v61 = vor.u32 %v568_v55, %v483_v54  ;;  %v769_v0 = vld [vmem:[%s852_s2] ss:$0 sm:$0xff] }
  0x11   :  { %v485_v59 = vld [vmem:[%s853_s0 + $0x78] sm:$0xf0]  ;;  %v456_v62 = vor.u32 %v559_v56, %v453_v57 }
  0x12   :  { %246 = vmatpush.bf16.msra.mxu0 %v572_v8  ;;  %589 = vmatpush.bf16.msra.mxu2 %v572_v8  ;;  %v488_v63 = vor.u32 %v567_v58, %v485_v59 }
  0x13   :  { %295 = vmatpush.bf16.msra.mxu1 %v580_v9  ;;  %597 = vmatpush.bf16.msra.mxu3 %v580_v9 }
  0x16   :  { %247 = vmatpush.bf16.msra.mxu0 %v571_v10  ;;  %590 = vmatpush.bf16.msra.mxu2 %v571_v10 }
  0x17   :  { %296 = vmatpush.bf16.msra.mxu1 %v579_v11  ;;  %598 = vmatpush.bf16.msra.mxu3 %v579_v11 }
  0x1a   :  { %248 = vmatpush.bf16.msra.mxu0 %v570_v12  ;;  %591 = vmatpush.bf16.msra.mxu2 %v570_v12 }
  0x1b   :  { %297 = vmatpush.bf16.msra.mxu1 %v578_v13  ;;  %599 = vmatpush.bf16.msra.mxu3 %v578_v13 }
  0x1e   :  { %249 = vmatpush.bf16.msra.mxu0 %v569_v14  ;;  %592 = vmatpush.bf16.msra.mxu2 %v569_v14 }
  0x1f   :  { %298 = vmatpush.bf16.msra.mxu1 %v577_v15  ;;  %600 = vmatpush.bf16.msra.mxu3 %v577_v15 }
  0x21   :  { %250 = vmatmul.bf16.vlgmr.msra.gmra.mxu0 %v428_v24  ;;  %270 = vmatmul.bf16.vlgmr.msra.gmra.mxu2 %v460_v25 }
  0x22   :  { %299 = vmatmul.bf16.vlgmr.msra.gmra.mxu1 %v432_v26  ;;  %319 = vmatmul.bf16.vlgmr.msra.gmra.mxu3 %v464_v27 }
  0x31   :  { %255 = vmatmul.bf16.gmra.mxu0 %v436_v36  ;;  %275 = vmatmul.bf16.gmra.mxu2 %v468_v37 }
  0x32   :  { %304 = vmatmul.bf16.gmra.mxu1 %v440_v38  ;;  %324 = vmatmul.bf16.gmra.mxu3 %v472_v39 }
  0x41   :  { %260 = vmatmul.bf16.gmra.mxu0 %v444_v48  ;;  %280 = vmatmul.bf16.gmra.mxu2 %v476_v49 }
  0x42   :  { %309 = vmatmul.bf16.gmra.mxu1 %v448_v50  ;;  %329 = vmatmul.bf16.gmra.mxu3 %v480_v51 }
  0x51   :  { %265 = vmatmul.bf16.gmra.mxu0 %v452_v60  ;;  %285 = vmatmul.bf16.gmra.mxu2 %v484_v61 }
  0x52   :  { %314 = vmatmul.bf16.gmra.mxu1 %v456_v62  ;;  %334 = vmatmul.bf16.gmra.mxu3 %v488_v63 }
  0x9e   :  { %v251_v1 = vpop.f32.mrf.mxu0 }
  0x9f   :  { %v252_v2 = vadd.f32 %v769_v0, %v251_v1  ;;  %v300_v3 = vpop.f32.mrf.mxu1 }
  0xa1   :  { %v301_v4 = vadd.f32 %v300_v3, %v252_v2 }
  0xa3   :  { %vm340_vm0 = vcmp.gt.f32.partialorder %v301_v4, 0.0  ;;  %v356_v5 = vmul.f32 0.2, %v301_v4 }
  0xa4   :  { %v271_v6 = vpop.f32.mrf.mxu2 }
  0xa5   :  { %v372_v7 = vsel %vm340_vm0, %v301_v4, %v356_v5  ;;  %v272_v8 = vadd.f32 %v769_v0, %v271_v6  ;;  %v320_v9 = vpop.f32.mrf.mxu3 }
  0xa6   :  { %v388_v10 = vpack.c.bf16 %v372_v7, %v372_v7  ;;  %v253_v11 = vpop.f32.mrf.mxu0 }
  0xa7   :  { %v321_v12 = vadd.f32 %v320_v9, %v272_v8  ;;  %v254_v13 = vadd.f32 %v769_v0, %v253_v11  ;;  %v302_v14 = vpop.f32.mrf.mxu1 }
  0xa8   :  { %405 = vst.msk [vmem:[%s854_s3] sm:$0xf] %vm404_vm1, %v388_v10 }
  0xa9   :  { %vm348_vm2 = vcmp.gt.f32.partialorder %v321_v12, 0.0  ;;  %v364_v15 = vmul.f32 0.2, %v321_v12  ;;  %v303_v16 = vadd.f32 %v302_v14, %v254_v13 }
  0xab   :  { %v380_v17 = vsel %vm348_vm2, %v321_v12, %v364_v15  ;;  %vm341_vm3 = vcmp.gt.f32.partialorder %v303_v16, 0.0  ;;  %v357_v18 = vmul.f32 0.2, %v303_v16 }
  0xac   :  { %v396_v19 = vpack.c.bf16 %v380_v17, %v380_v17  ;;  %v273_v20 = vpop.f32.mrf.mxu2 }
  0xad   :  { %v373_v21 = vsel %vm341_vm3, %v303_v16, %v357_v18  ;;  %v274_v22 = vadd.f32 %v769_v0, %v273_v20  ;;  %v322_v23 = vpop.f32.mrf.mxu3 }
  0xae   :  { %413 = vst.msk [vmem:[%s854_s3 + $0x20] sm:$0xf] %vm404_vm1, %v396_v19  ;;  %v389_v24 = vpack.c.bf16 %v373_v21, %v373_v21  ;;  %v256_v25 = vpop.f32.mrf.mxu0 }
  0xaf   :  { %v323_v26 = vadd.f32 %v322_v23, %v274_v22  ;;  %v257_v27 = vadd.f32 %v769_v0, %v256_v25  ;;  %v305_v28 = vpop.f32.mrf.mxu1 }
  0xb0   :  { %406 = vst.msk [vmem:[%s854_s3 + $0x4] sm:$0xf] %vm404_vm1, %v389_v24 }
  0xb1   :  { %vm349_vm4 = vcmp.gt.f32.partialorder %v323_v26, 0.0  ;;  %v365_v29 = vmul.f32 0.2, %v323_v26  ;;  %v306_v30 = vadd.f32 %v305_v28, %v257_v27 }
  0xb3   :  { %v381_v31 = vsel %vm349_vm4, %v323_v26, %v365_v29  ;;  %vm342_vm5 = vcmp.gt.f32.partialorder %v306_v30, 0.0  ;;  %v358_v32 = vmul.f32 0.2, %v306_v30 }
  0xb4   :  { %v397_v33 = vpack.c.bf16 %v381_v31, %v381_v31  ;;  %v276_v34 = vpop.f32.mrf.mxu2 }
  0xb5   :  { %v374_v35 = vsel %vm342_vm5, %v306_v30, %v358_v32  ;;  %v277_v36 = vadd.f32 %v769_v0, %v276_v34  ;;  %v325_v37 = vpop.f32.mrf.mxu3 }
  0xb6   :  { %414 = vst.msk [vmem:[%s854_s3 + $0x24] sm:$0xf] %vm404_vm1, %v397_v33  ;;  %v390_v38 = vpack.c.bf16 %v374_v35, %v374_v35  ;;  %v258_v39 = vpop.f32.mrf.mxu0 }
  0xb7   :  { %v326_v40 = vadd.f32 %v325_v37, %v277_v36  ;;  %v259_v41 = vadd.f32 %v769_v0, %v258_v39  ;;  %v307_v42 = vpop.f32.mrf.mxu1 }
  0xb8   :  { %407 = vst.msk [vmem:[%s854_s3 + $0x8] sm:$0xf] %vm404_vm1, %v390_v38 }
  0xb9   :  { %vm350_vm6 = vcmp.gt.f32.partialorder %v326_v40, 0.0  ;;  %v366_v43 = vmul.f32 0.2, %v326_v40  ;;  %v308_v44 = vadd.f32 %v307_v42, %v259_v41 }
  0xbb   :  { %v382_v45 = vsel %vm350_vm6, %v326_v40, %v366_v43  ;;  %vm343_vm7 = vcmp.gt.f32.partialorder %v308_v44, 0.0  ;;  %v359_v46 = vmul.f32 0.2, %v308_v44 }
  0xbc   :  { %v398_v47 = vpack.c.bf16 %v382_v45, %v382_v45  ;;  %v278_v48 = vpop.f32.mrf.mxu2 }
  0xbd   :  { %v375_v49 = vsel %vm343_vm7, %v308_v44, %v359_v46  ;;  %v279_v50 = vadd.f32 %v769_v0, %v278_v48  ;;  %v327_v51 = vpop.f32.mrf.mxu3 }
  0xbe   :  { %415 = vst.msk [vmem:[%s854_s3 + $0x28] sm:$0xf] %vm404_vm1, %v398_v47  ;;  %v391_v52 = vpack.c.bf16 %v375_v49, %v375_v49  ;;  %v261_v53 = vpop.f32.mrf.mxu0 }
  0xbf   :  { %v328_v54 = vadd.f32 %v327_v51, %v279_v50  ;;  %v262_v55 = vadd.f32 %v769_v0, %v261_v53  ;;  %v310_v56 = vpop.f32.mrf.mxu1 }
  0xc0   :  { %408 = vst.msk [vmem:[%s854_s3 + $0xc] sm:$0xf] %vm404_vm1, %v391_v52 }
  0xc1   :  { %vm351_vm8 = vcmp.gt.f32.partialorder %v328_v54, 0.0  ;;  %v367_v57 = vmul.f32 0.2, %v328_v54  ;;  %v311_v58 = vadd.f32 %v310_v56, %v262_v55 }
  0xc3   :  { %v383_v59 = vsel %vm351_vm8, %v328_v54, %v367_v57  ;;  %vm344_vm9 = vcmp.gt.f32.partialorder %v311_v58, 0.0  ;;  %v360_v60 = vmul.f32 0.2, %v311_v58 }
  0xc4   :  { %v399_v61 = vpack.c.bf16 %v383_v59, %v383_v59  ;;  %v281_v62 = vpop.f32.mrf.mxu2 }
  0xc5   :  { %v376_v63 = vsel %vm344_vm9, %v311_v58, %v360_v60  ;;  %v282_v1 = vadd.f32 %v769_v0, %v281_v62  ;;  %v330_v2 = vpop.f32.mrf.mxu3 }
  0xc6   :  { %416 = vst.msk [vmem:[%s854_s3 + $0x2c] sm:$0xf] %vm404_vm1, %v399_v61  ;;  %v392_v3 = vpack.c.bf16 %v376_v63, %v376_v63  ;;  %v263_v4 = vpop.f32.mrf.mxu0 }
  0xc7   :  { %v331_v5 = vadd.f32 %v330_v2, %v282_v1  ;;  %v264_v6 = vadd.f32 %v769_v0, %v263_v4  ;;  %v312_v7 = vpop.f32.mrf.mxu1 }
  0xc8   :  { %409 = vst.msk [vmem:[%s854_s3 + $0x10] sm:$0xf] %vm404_vm1, %v392_v3 }
  0xc9   :  { %vm352_vm10 = vcmp.gt.f32.partialorder %v331_v5, 0.0  ;;  %v368_v8 = vmul.f32 0.2, %v331_v5  ;;  %v313_v9 = vadd.f32 %v312_v7, %v264_v6 }
  0xcb   :  { %v384_v10 = vsel %vm352_vm10, %v331_v5, %v368_v8  ;;  %vm345_vm11 = vcmp.gt.f32.partialorder %v313_v9, 0.0  ;;  %v361_v11 = vmul.f32 0.2, %v313_v9 }
  0xcc   :  { %v400_v12 = vpack.c.bf16 %v384_v10, %v384_v10  ;;  %v283_v13 = vpop.f32.mrf.mxu2 }
  0xcd   :  { %v377_v14 = vsel %vm345_vm11, %v313_v9, %v361_v11  ;;  %v284_v15 = vadd.f32 %v769_v0, %v283_v13  ;;  %v332_v16 = vpop.f32.mrf.mxu3 }
  0xce   :  { %417 = vst.msk [vmem:[%s854_s3 + $0x30] sm:$0xf] %vm404_vm1, %v400_v12  ;;  %v393_v17 = vpack.c.bf16 %v377_v14, %v377_v14  ;;  %v266_v18 = vpop.f32.mrf.mxu0 }
  0xcf   :  { %v333_v19 = vadd.f32 %v332_v16, %v284_v15  ;;  %v267_v20 = vadd.f32 %v769_v0, %v266_v18  ;;  %v315_v21 = vpop.f32.mrf.mxu1 }
  0xd0   :  { %410 = vst.msk [vmem:[%s854_s3 + $0x14] sm:$0xf] %vm404_vm1, %v393_v17 }
  0xd1   :  { %vm353_vm12 = vcmp.gt.f32.partialorder %v333_v19, 0.0  ;;  %v369_v22 = vmul.f32 0.2, %v333_v19  ;;  %v316_v23 = vadd.f32 %v315_v21, %v267_v20 }
  0xd3   :  { %v385_v24 = vsel %vm353_vm12, %v333_v19, %v369_v22  ;;  %vm346_vm13 = vcmp.gt.f32.partialorder %v316_v23, 0.0  ;;  %v362_v25 = vmul.f32 0.2, %v316_v23 }
  0xd4   :  { %v401_v26 = vpack.c.bf16 %v385_v24, %v385_v24  ;;  %v286_v27 = vpop.f32.mrf.mxu2 }
  0xd5   :  { %v378_v28 = vsel %vm346_vm13, %v316_v23, %v362_v25  ;;  %v287_v29 = vadd.f32 %v769_v0, %v286_v27  ;;  %v335_v30 = vpop.f32.mrf.mxu3 }
  0xd6   :  { %418 = vst.msk [vmem:[%s854_s3 + $0x34] sm:$0xf] %vm404_vm1, %v401_v26  ;;  %v394_v31 = vpack.c.bf16 %v378_v28, %v378_v28  ;;  %v268_v32 = vpop.f32.mrf.mxu0 }
  0xd7   :  { %v336_v33 = vadd.f32 %v335_v30, %v287_v29  ;;  %v269_v34 = vadd.f32 %v769_v0, %v268_v32  ;;  %v317_v35 = vpop.f32.mrf.mxu1 }
  0xd8   :  { %411 = vst.msk [vmem:[%s854_s3 + $0x18] sm:$0xf] %vm404_vm1, %v394_v31 }
  0xd9   :  { %vm354_vm14 = vcmp.gt.f32.partialorder %v336_v33, 0.0  ;;  %v370_v36 = vmul.f32 0.2, %v336_v33  ;;  %v318_v37 = vadd.f32 %v317_v35, %v269_v34 }
  0xdb   :  { %v386_v38 = vsel %vm354_vm14, %v336_v33, %v370_v36  ;;  %vm347_vm15 = vcmp.gt.f32.partialorder %v318_v37, 0.0  ;;  %v363_v39 = vmul.f32 0.2, %v318_v37 }
  0xdc   :  { %v402_v40 = vpack.c.bf16 %v386_v38, %v386_v38  ;;  %v288_v41 = vpop.f32.mrf.mxu2 }
  0xdd   :  { %v379_v42 = vsel %vm347_vm15, %v318_v37, %v363_v39  ;;  %v289_v43 = vadd.f32 %v769_v0, %v288_v41  ;;  %v337_v45 = vpop.f32.mrf.mxu3 }
  0xde   :  { %419 = vst.msk [vmem:[%s854_s3 + $0x38] sm:$0xf] %vm404_vm1, %v402_v40  ;;  %v395_v44 = vpack.c.bf16 %v379_v42, %v379_v42 }
  0xdf   :  { %v338_v46 = vadd.f32 %v337_v45, %v289_v43 }
  0xe0   :  { %412 = vst.msk [vmem:[%s854_s3 + $0x1c] sm:$0xf] %vm404_vm1, %v395_v44 }
  0xe1   :  { %vm355_vm0 = vcmp.gt.f32.partialorder %v338_v46, 0.0  ;;  %v371_v47 = vmul.f32 0.2, %v338_v46 }
  0xe3   :  { %v387_v48 = vsel %vm355_vm0, %v338_v46, %v371_v47 }
  0xe4   :  { %v403_v49 = vpack.c.bf16 %v387_v48, %v387_v48 }
  0xe6   :  { %420 = vst.msk [vmem:[%s854_s3 + $0x3c] sm:$0xf] %vm404_vm1, %v403_v49 }

// kernel: discriminator_forward.6
= control target key start
LH: loop header
LB: loop body
LE: loop exit
PB: predicated region body
PF: predicated region fallthrough
CT: control target
= control target key end

     0   :  { %vm414_vm1 = vcmask 519168   ;;  %s807_s1 = inlined_call_operand.vmem [shape: bf16[512,64], index: 1, kind: input, shape index: {}]   ;;  %s808_s2 = inlined_call_operand.vmem [shape: f32[1,64], index: 2, kind: input, shape index: {}]   ;;  %s809_s0 = inlined_call_operand.vmem [shape: bf16[32,512], index: 0, kind: input, shape index: {}]   ;;  %s810_s3 = inlined_call_operand.vmem [shape: bf16[32,64], index: 3, kind: output, shape index: {}]  }
   0x1   :  { %v598_v0 = vld [vmem:[%s807_s1 + $0x38] sm:$0xff]  ;;  %v597_v4 = vld [vmem:[%s807_s1 + $0x30] sm:$0xff]  ;;  %v596_v8 = vld [vmem:[%s807_s1 + $0x28] sm:$0xff] }
   0x2   :  { %v606_v1 = vld [vmem:[%s807_s1 + $0x78] sm:$0xff]  ;;  %322 = vmatpush.bf16.msra.mxu0 %v598_v0  ;;  %v605_v5 = vld [vmem:[%s807_s1 + $0x70] sm:$0xff]  ;;  %v604_v9 = vld [vmem:[%s807_s1 + $0x68] sm:$0xff] }
   0x3   :  { %v614_v2 = vld [vmem:[%s807_s1 + $0xb8] sm:$0xff]  ;;  %341 = vmatpush.bf16.msra.mxu1 %v606_v1  ;;  %v613_v6 = vld [vmem:[%s807_s1 + $0xb0] sm:$0xff]  ;;  %v612_v10 = vld [vmem:[%s807_s1 + $0xa8] sm:$0xff] }
   0x4   :  { %v622_v3 = vld [vmem:[%s807_s1 + $0xf8] sm:$0xff]  ;;  %360 = vmatpush.bf16.msra.mxu2 %v614_v2  ;;  %v621_v7 = vld [vmem:[%s807_s1 + $0xf0] sm:$0xff]  ;;  %v620_v11 = vld [vmem:[%s807_s1 + $0xe8] sm:$0xff] }
   0x5   :  { %379 = vmatpush.bf16.msra.mxu3 %v622_v3  ;;  %v595_v12 = vld [vmem:[%s807_s1 + $0x20] sm:$0xff]  ;;  %v594_v16 = vld [vmem:[%s807_s1 + $0x18] sm:$0xff]  ;;  %v593_v20 = vld [vmem:[%s807_s1 + $0x10] sm:$0xff] }
   0x6   :  { %323 = vmatpush.bf16.msra.mxu0 %v597_v4  ;;  %v603_v13 = vld [vmem:[%s807_s1 + $0x60] sm:$0xff]  ;;  %v602_v17 = vld [vmem:[%s807_s1 + $0x58] sm:$0xff]  ;;  %v601_v21 = vld [vmem:[%s807_s1 + $0x50] sm:$0xff] }
   0x7   :  { %342 = vmatpush.bf16.msra.mxu1 %v605_v5  ;;  %v611_v14 = vld [vmem:[%s807_s1 + $0xa0] sm:$0xff]  ;;  %v610_v18 = vld [vmem:[%s807_s1 + $0x98] sm:$0xff]  ;;  %v609_v22 = vld [vmem:[%s807_s1 + $0x90] sm:$0xff] }
   0x8   :  { %361 = vmatpush.bf16.msra.mxu2 %v613_v6  ;;  %v619_v15 = vld [vmem:[%s807_s1 + $0xe0] sm:$0xff]  ;;  %v618_v19 = vld [vmem:[%s807_s1 + $0xd8] sm:$0xff]  ;;  %v617_v23 = vld [vmem:[%s807_s1 + $0xd0] sm:$0xff] }
   0x9   :  { %380 = vmatpush.bf16.msra.mxu3 %v621_v7  ;;  %v592_v24 = vld [vmem:[%s807_s1 + $0x8] sm:$0xff]  ;;  %v591_v28 = vld [vmem:[%s807_s1] sm:$0xff]  ;;  %v585_v33 = vld [vmem:[%s809_s0 + $0xc] sm:$0xf0] }
   0xa   :  { %324 = vmatpush.bf16.msra.mxu0 %v596_v8  ;;  %v600_v25 = vld [vmem:[%s807_s1 + $0x48] sm:$0xff]  ;;  %v599_v29 = vld [vmem:[%s807_s1 + $0x40] sm:$0xff]  ;;  %v427_v35 = vld [vmem:[%s809_s0 + $0x10] sm:$0xf0] }
   0xb   :  { %343 = vmatpush.bf16.msra.mxu1 %v604_v9  ;;  %v608_v26 = vld [vmem:[%s807_s1 + $0x88] sm:$0xff]  ;;  %v607_v30 = vld [vmem:[%s807_s1 + $0x80] sm:$0xff]  ;;  %v586_v37 = vld [vmem:[%s809_s0 + $0x14] sm:$0xf0] }
   0xc   :  { %362 = vmatpush.bf16.msra.mxu2 %v612_v10  ;;  %v616_v27 = vld [vmem:[%s807_s1 + $0xc8] sm:$0xff]  ;;  %v615_v31 = vld [vmem:[%s807_s1 + $0xc0] sm:$0xff]  ;;  %v435_v39 = vld [vmem:[%s809_s0 + $0x18] sm:$0xf0] }
   0xd   :  { %381 = vmatpush.bf16.msra.mxu3 %v620_v11  ;;  %v425_v32 = vld [vmem:[%s809_s0] sm:$0xf]  ;;  %v583_v34 = vld [vmem:[%s809_s0 + $0x4] sm:$0xf]  ;;  %v433_v36 = vld [vmem:[%s809_s0 + $0x8] sm:$0xf] }
   0xe   :  { %325 = vmatpush.bf16.msra.mxu0 %v595_v12  ;;  %v584_v38 = vld [vmem:[%s809_s0 + $0xc] sm:$0xf]  ;;  %v426_v40 = vor.u32 %v585_v33, %v425_v32  ;;  %v430_v41 = vor.u32 %v583_v34, %v427_v35  ;;  %v434_v42 = vor.u32 %v586_v37, %v433_v36  ;;  %v441_v44 = vld [vmem:[%s809_s0 + $0x20] sm:$0xf]  ;;  %v589_v45 = vld [vmem:[%s809_s0 + $0x2c] sm:$0xf0] }
   0xf   :  { %344 = vmatpush.bf16.msra.mxu1 %v603_v13  ;;  %v438_v43 = vor.u32 %v584_v38, %v435_v39  ;;  %v587_v46 = vld [vmem:[%s809_s0 + $0x24] sm:$0xf]  ;;  %v443_v47 = vld [vmem:[%s809_s0 + $0x30] sm:$0xf0]  ;;  %v449_v48 = vld [vmem:[%s809_s0 + $0x28] sm:$0xf]  ;;  %v442_v52 = vor.u32 %v589_v45, %v441_v44 }
  0x10   :  { %363 = vmatpush.bf16.msra.mxu2 %v611_v14  ;;  %v590_v49 = vld [vmem:[%s809_s0 + $0x34] sm:$0xf0]  ;;  %v588_v50 = vld [vmem:[%s809_s0 + $0x2c] sm:$0xf]  ;;  %v451_v51 = vld [vmem:[%s809_s0 + $0x38] sm:$0xf0]  ;;  %v446_v53 = vor.u32 %v587_v46, %v443_v47 }
  0x11   :  { %382 = vmatpush.bf16.msra.mxu3 %v619_v15  ;;  %v450_v54 = vor.u32 %v590_v49, %v449_v48  ;;  %v454_v55 = vor.u32 %v588_v50, %v451_v51  ;;  %v623_v56 = vld [vmem:[%s808_s2] ss:$0 sm:$0xff] }
  0x12   :  { %326 = vmatpush.bf16.msra.mxu0 %v594_v16 }
  0x13   :  { %345 = vmatpush.bf16.msra.mxu1 %v602_v17 }
  0x14   :  { %364 = vmatpush.bf16.msra.mxu2 %v610_v18 }
  0x15   :  { %383 = vmatpush.bf16.msra.mxu3 %v618_v19 }
  0x16   :  { %327 = vmatpush.bf16.msra.mxu0 %v593_v20 }
  0x17   :  { %346 = vmatpush.bf16.msra.mxu1 %v601_v21 }
  0x18   :  { %365 = vmatpush.bf16.msra.mxu2 %v609_v22 }
  0x19   :  { %384 = vmatpush.bf16.msra.mxu3 %v617_v23 }
  0x1a   :  { %328 = vmatpush.bf16.msra.mxu0 %v592_v24 }
  0x1b   :  { %347 = vmatpush.bf16.msra.mxu1 %v600_v25 }
  0x1c   :  { %366 = vmatpush.bf16.msra.mxu2 %v608_v26 }
  0x1d   :  { %385 = vmatpush.bf16.msra.mxu3 %v616_v27 }
  0x1e   :  { %329 = vmatpush.bf16.msra.mxu0 %v591_v28 }
  0x1f   :  { %348 = vmatpush.bf16.msra.mxu1 %v599_v29 }
  0x20   :  { %367 = vmatpush.bf16.msra.mxu2 %v607_v30 }
  0x21   :  { %386 = vmatpush.bf16.msra.mxu3 %v615_v31  ;;  %330 = vmatmul.bf16.vlgmr.msra.gmra.mxu0 %v426_v40 }
  0x22   :  { %349 = vmatmul.bf16.vlgmr.msra.gmra.mxu1 %v430_v41 }
  0x23   :  { %368 = vmatmul.bf16.vlgmr.msra.gmra.mxu2 %v434_v42 }
  0x24   :  { %387 = vmatmul.bf16.vlgmr.msra.gmra.mxu3 %v438_v43 }
  0x31   :  { %335 = vmatmul.bf16.gmra.mxu0 %v442_v52 }
  0x32   :  { %354 = vmatmul.bf16.gmra.mxu1 %v446_v53 }
  0x33   :  { %373 = vmatmul.bf16.gmra.mxu2 %v450_v54 }
  0x34   :  { %392 = vmatmul.bf16.gmra.mxu3 %v454_v55 }
  0x9e   :  { %v331_v57 = vpop.f32.mrf.mxu0 }
  0x9f   :  { %v350_v58 = vpop.f32.mrf.mxu1  ;;  %v332_v59 = vadd.f32 %v623_v56, %v331_v57 }
  0xa1   :  { %v351_v60 = vadd.f32 %v350_v58, %v332_v59 }
  0xa6   :  { %v369_v61 = vpop.f32.mrf.mxu2  ;;  %v333_v0 = vpop.f32.mrf.mxu0 }
  0xa7   :  { %v388_v62 = vpop.f32.mrf.mxu3  ;;  %v370_v63 = vadd.f32 %v369_v61, %v351_v60  ;;  %v352_v1 = vpop.f32.mrf.mxu1  ;;  %v334_v3 = vadd.f32 %v623_v56, %v333_v0 }
  0xa9   :  { %v389_v2 = vadd.f32 %v388_v62, %v370_v63  ;;  %v353_v6 = vadd.f32 %v352_v1, %v334_v3 }
  0xab   :  { %vm398_vm0 = vcmp.gt.f32.partialorder %v389_v2, 0.0  ;;  %v402_v4 = vmul.f32 0.2, %v389_v2 }
  0xad   :  { %v406_v5 = vsel %vm398_vm0, %v389_v2, %v402_v4 }
  0xae   :  { %v410_v7 = vpack.c.bf16 %v406_v5, %v406_v5  ;;  %v371_v8 = vpop.f32.mrf.mxu2  ;;  %v336_v11 = vpop.f32.mrf.mxu0 }
  0xaf   :  { %v390_v9 = vpop.f32.mrf.mxu3  ;;  %v372_v10 = vadd.f32 %v371_v8, %v353_v6  ;;  %v337_v12 = vadd.f32 %v623_v56, %v336_v11  ;;  %v355_v14 = vpop.f32.mrf.mxu1 }
  0xb0   :  { %415 = vst.msk [vmem:[%s810_s3] sm:$0xf] %vm414_vm1, %v410_v7 }
  0xb1   :  { %v391_v13 = vadd.f32 %v390_v9, %v372_v10  ;;  %v356_v16 = vadd.f32 %v355_v14, %v337_v12 }
  0xb3   :  { %vm399_vm2 = vcmp.gt.f32.partialorder %v391_v13, 0.0  ;;  %v403_v15 = vmul.f32 0.2, %v391_v13 }
  0xb5   :  { %v407_v17 = vsel %vm399_vm2, %v391_v13, %v403_v15 }
  0xb6   :  { %v411_v18 = vpack.c.bf16 %v407_v17, %v407_v17  ;;  %v374_v19 = vpop.f32.mrf.mxu2  ;;  %v338_v22 = vpop.f32.mrf.mxu0 }
  0xb7   :  { %v393_v20 = vpop.f32.mrf.mxu3  ;;  %v375_v21 = vadd.f32 %v374_v19, %v356_v16  ;;  %v339_v24 = vadd.f32 %v623_v56, %v338_v22  ;;  %v357_v26 = vpop.f32.mrf.mxu1 }
  0xb8   :  { %416 = vst.msk [vmem:[%s810_s3 + $0x4] sm:$0xf] %vm414_vm1, %v411_v18 }
  0xb9   :  { %v394_v23 = vadd.f32 %v393_v20, %v375_v21  ;;  %v358_v28 = vadd.f32 %v357_v26, %v339_v24 }
  0xbb   :  { %vm400_vm3 = vcmp.gt.f32.partialorder %v394_v23, 0.0  ;;  %v404_v25 = vmul.f32 0.2, %v394_v23 }
  0xbd   :  { %v408_v27 = vsel %vm400_vm3, %v394_v23, %v404_v25 }
  0xbe   :  { %v412_v29 = vpack.c.bf16 %v408_v27, %v408_v27  ;;  %v376_v30 = vpop.f32.mrf.mxu2 }
  0xbf   :  { %v377_v31 = vadd.f32 %v376_v30, %v358_v28  ;;  %v395_v32 = vpop.f32.mrf.mxu3 }
  0xc0   :  { %417 = vst.msk [vmem:[%s810_s3 + $0x8] sm:$0xf] %vm414_vm1, %v412_v29 }
  0xc1   :  { %v396_v33 = vadd.f32 %v395_v32, %v377_v31 }
  0xc3   :  { %vm401_vm4 = vcmp.gt.f32.partialorder %v396_v33, 0.0  ;;  %v405_v34 = vmul.f32 0.2, %v396_v33 }
  0xc5   :  { %v409_v35 = vsel %vm401_vm4, %v396_v33, %v405_v34 }
  0xc6   :  { %v413_v36 = vpack.c.bf16 %v409_v35, %v409_v35 }
  0xc8   :  { %418 = vst.msk [vmem:[%s810_s3 + $0xc] sm:$0xf] %vm414_vm1, %v413_v36 }

// kernel: discriminator_forward.7
= control target key start
LH: loop header
LB: loop body
LE: loop exit
PB: predicated region body
PF: predicated region fallthrough
CT: control target
= control target key end

     0   :  { %vm672_vm0 = vcmask 7168   ;;  %s1231_s1 = inlined_call_operand.vmem [shape: bf16[1024,1], index: 1, kind: input, shape index: {}]   ;;  %s1232_s0 = inlined_call_operand.vmem [shape: bf16[8,1024], index: 0, kind: input, shape index: {}]   ;;  %s1233_s2 = inlined_call_operand.<no memory space> [shape: f32[1,1], index: 2, kind: input, shape index: {}]   ;;  %s1234_s3 = inlined_call_operand.vmem [shape: f32[8,1], index: 3, kind: output, shape index: {}]  }
   0x1   :  { %v941_v0 = vld [vmem:[%s1231_s1 + $0x38] sm:$0xff]  ;;  %v940_v4 = vld [vmem:[%s1231_s1 + $0x30] sm:$0xff]  ;;  %v939_v8 = vld [vmem:[%s1231_s1 + $0x28] sm:$0xff]  ;;  %v8_v48 = vstv %s1233_s2 }
   0x2   :  { %v949_v1 = vld [vmem:[%s1231_s1 + $0x78] sm:$0xff]  ;;  %564 = vmatpush.bf16.msra.mxu0 %v941_v0  ;;  %v948_v5 = vld [vmem:[%s1231_s1 + $0x70] sm:$0xff]  ;;  %v947_v9 = vld [vmem:[%s1231_s1 + $0x68] sm:$0xff]  ;;  %9 = vst [vmem:[#allocation2] sm:$0x1] %v8_v48 }
   0x3   :  { %v957_v2 = vld [vmem:[%s1231_s1 + $0xb8] sm:$0xff]  ;;  %577 = vmatpush.bf16.msra.mxu1 %v949_v1  ;;  %v956_v6 = vld [vmem:[%s1231_s1 + $0xb0] sm:$0xff]  ;;  %v955_v10 = vld [vmem:[%s1231_s1 + $0xa8] sm:$0xff] }
   0x4   :  { %v965_v3 = vld [vmem:[%s1231_s1 + $0xf8] sm:$0xff]  ;;  %590 = vmatpush.bf16.msra.mxu2 %v957_v2  ;;  %v964_v7 = vld [vmem:[%s1231_s1 + $0xf0] sm:$0xff]  ;;  %v963_v11 = vld [vmem:[%s1231_s1 + $0xe8] sm:$0xff] }
   0x5   :  { %603 = vmatpush.bf16.msra.mxu3 %v965_v3  ;;  %v938_v12 = vld [vmem:[%s1231_s1 + $0x20] sm:$0xff]  ;;  %v937_v16 = vld [vmem:[%s1231_s1 + $0x18] sm:$0xff]  ;;  %v936_v20 = vld [vmem:[%s1231_s1 + $0x10] sm:$0xff] }
   0x6   :  { %565 = vmatpush.bf16.msra.mxu0 %v940_v4  ;;  %v946_v13 = vld [vmem:[%s1231_s1 + $0x60] sm:$0xff]  ;;  %v945_v17 = vld [vmem:[%s1231_s1 + $0x58] sm:$0xff]  ;;  %v944_v21 = vld [vmem:[%s1231_s1 + $0x50] sm:$0xff] }
   0x7   :  { %578 = vmatpush.bf16.msra.mxu1 %v948_v5  ;;  %v954_v14 = vld [vmem:[%s1231_s1 + $0xa0] sm:$0xff]  ;;  %v953_v18 = vld [vmem:[%s1231_s1 + $0x98] sm:$0xff]  ;;  %v952_v22 = vld [vmem:[%s1231_s1 + $0x90] sm:$0xff] }
   0x8   :  { %591 = vmatpush.bf16.msra.mxu2 %v956_v6  ;;  %v962_v15 = vld [vmem:[%s1231_s1 + $0xe0] sm:$0xff]  ;;  %v961_v19 = vld [vmem:[%s1231_s1 + $0xd8] sm:$0xff]  ;;  %v960_v23 = vld [vmem:[%s1231_s1 + $0xd0] sm:$0xff] }
   0x9   :  { %604 = vmatpush.bf16.msra.mxu3 %v964_v7  ;;  %v935_v24 = vld [vmem:[%s1231_s1 + $0x8] sm:$0xff]  ;;  %v16_v29 = vld [vmem:[%s1232_s0] sm:$0xff]  ;;  %v973_v38 = vld [vmem:[%s1231_s1 + $0x138] sm:$0xff] }
   0xa   :  { %566 = vmatpush.bf16.msra.mxu0 %v939_v8  ;;  %v943_v25 = vld [vmem:[%s1231_s1 + $0x48] sm:$0xff]  ;;  %v934_v30 = vld [vmem:[%s1231_s1] sm:$0xff]  ;;  %v156_v33 = vunpack.c.l.b16 %v16_v29  ;;  %v157_v37 = vunpack.c.h.b16 %v16_v29  ;;  %v981_v39 = vld [vmem:[%s1231_s1 + $0x178] sm:$0xff] }
   0xb   :  { %579 = vmatpush.bf16.msra.mxu1 %v947_v9  ;;  %v951_v26 = vld [vmem:[%s1231_s1 + $0x88] sm:$0xff]  ;;  %v942_v31 = vld [vmem:[%s1231_s1 + $0x40] sm:$0xff]  ;;  %v989_v40 = vld [vmem:[%s1231_s1 + $0x1b8] sm:$0xff] }
   0xc   :  { %592 = vmatpush.bf16.msra.mxu2 %v955_v10  ;;  %v959_v27 = vld [vmem:[%s1231_s1 + $0xc8] sm:$0xff]  ;;  %v950_v34 = vld [vmem:[%s1231_s1 + $0x80] sm:$0xff]  ;;  %v997_v41 = vld [vmem:[%s1231_s1 + $0x1f8] sm:$0xff]  ;;  %v164_v43 = vpack.c.b16 %v156_v33, %v156_v33  ;;  %v165_v45 = vpack.c.b16 %v157_v37, %v157_v37 }
   0xd   :  { %605 = vmatpush.bf16.msra.mxu3 %v963_v11  ;;  %v17_v28 = vld [vmem:[%s1232_s0 + $0x8] sm:$0xff]  ;;  %v958_v35 = vld [vmem:[%s1231_s1 + $0xc0] sm:$0xff]  ;;  %v972_v46 = vld [vmem:[%s1231_s1 + $0x130] sm:$0xff] }
   0xe   :  { %567 = vmatpush.bf16.msra.mxu0 %v938_v12  ;;  %v158_v32 = vunpack.c.l.b16 %v17_v28  ;;  %v159_v36 = vunpack.c.h.b16 %v17_v28  ;;  %v980_v47 = vld [vmem:[%s1231_s1 + $0x170] sm:$0xff]  ;;  %v971_v51 = vld [vmem:[%s1231_s1 + $0x128] sm:$0xff]  ;;  %v970_v55 = vld [vmem:[%s1231_s1 + $0x120] sm:$0xff] }
   0xf   :  { %580 = vmatpush.bf16.msra.mxu1 %v946_v13  ;;  %v988_v49 = vld [vmem:[%s1231_s1 + $0x1b0] sm:$0xff]  ;;  %v979_v52 = vld [vmem:[%s1231_s1 + $0x168] sm:$0xff]  ;;  %v978_v56 = vld [vmem:[%s1231_s1 + $0x160] sm:$0xff] }
  0x10   :  { %593 = vmatpush.bf16.msra.mxu2 %v954_v14  ;;  %v166_v42 = vpack.c.b16 %v158_v32, %v158_v32  ;;  %v167_v44 = vpack.c.b16 %v159_v36, %v159_v36  ;;  %v996_v50 = vld [vmem:[%s1231_s1 + $0x1f0] sm:$0xff]  ;;  %v987_v53 = vld [vmem:[%s1231_s1 + $0x1a8] sm:$0xff]  ;;  %v986_v57 = vld [vmem:[%s1231_s1 + $0x1a0] sm:$0xff] }
  0x11   :  { %606 = vmatpush.bf16.msra.mxu3 %v962_v15  ;;  %v995_v54 = vld [vmem:[%s1231_s1 + $0x1e8] sm:$0xff]  ;;  %v994_v58 = vld [vmem:[%s1231_s1 + $0x1e0] sm:$0xff]  ;;  %v969_v59 = vld [vmem:[%s1231_s1 + $0x118] sm:$0xff] }
  0x12   :  { %568 = vmatpush.bf16.msra.mxu0 %v937_v16  ;;  %v977_v60 = vld [vmem:[%s1231_s1 + $0x158] sm:$0xff]  ;;  %v968_v63 = vld [vmem:[%s1231_s1 + $0x110] sm:$0xff]  ;;  %v967_v3 = vld [vmem:[%s1231_s1 + $0x108] sm:$0xff] }
  0x13   :  { %581 = vmatpush.bf16.msra.mxu1 %v945_v17  ;;  %v985_v61 = vld [vmem:[%s1231_s1 + $0x198] sm:$0xff]  ;;  %v976_v0 = vld [vmem:[%s1231_s1 + $0x150] sm:$0xff]  ;;  %v975_v4 = vld [vmem:[%s1231_s1 + $0x148] sm:$0xff] }
  0x14   :  { %594 = vmatpush.bf16.msra.mxu2 %v953_v18  ;;  %v993_v62 = vld [vmem:[%s1231_s1 + $0x1d8] sm:$0xff]  ;;  %v984_v1 = vld [vmem:[%s1231_s1 + $0x190] sm:$0xff]  ;;  %v983_v6 = vld [vmem:[%s1231_s1 + $0x188] sm:$0xff] }
  0x15   :  { %607 = vmatpush.bf16.msra.mxu3 %v961_v19  ;;  %v992_v2 = vld [vmem:[%s1231_s1 + $0x1d0] sm:$0xff]  ;;  %v991_v7 = vld [vmem:[%s1231_s1 + $0x1c8] sm:$0xff]  ;;  %v19_v8 = vld [vmem:[%s1232_s0 + $0x18] sm:$0xff] }
  0x16   :  { %569 = vmatpush.bf16.msra.mxu0 %v936_v20  ;;  %v18_v5 = vld [vmem:[%s1232_s0 + $0x10] sm:$0xff]  ;;  %v966_v11 = vld [vmem:[%s1231_s1 + $0x100] sm:$0xff]  ;;  %v162_v13 = vunpack.c.l.b16 %v19_v8  ;;  %v163_v14 = vunpack.c.h.b16 %v19_v8 }
  0x17   :  { %582 = vmatpush.bf16.msra.mxu1 %v944_v21  ;;  %v160_v9 = vunpack.c.l.b16 %v18_v5  ;;  %v161_v10 = vunpack.c.h.b16 %v18_v5  ;;  %v974_v12 = vld [vmem:[%s1231_s1 + $0x140] sm:$0xff] }
  0x18   :  { %595 = vmatpush.bf16.msra.mxu2 %v952_v22  ;;  %v982_v15 = vld [vmem:[%s1231_s1 + $0x180] sm:$0xff]  ;;  %v170_v19 = vpack.c.b16 %v162_v13, %v162_v13  ;;  %v171_v20 = vpack.c.b16 %v163_v14, %v163_v14 }
  0x19   :  { %608 = vmatpush.bf16.msra.mxu3 %v960_v23  ;;  %v990_v16 = vld [vmem:[%s1231_s1 + $0x1c0] sm:$0xff]  ;;  %v168_v17 = vpack.c.b16 %v160_v9, %v160_v9  ;;  %v169_v18 = vpack.c.b16 %v161_v10, %v161_v10 }
  0x1a   :  { %570 = vmatpush.bf16.msra.mxu0 %v935_v24 }
  0x1b   :  { %583 = vmatpush.bf16.msra.mxu1 %v943_v25 }
  0x1c   :  { %596 = vmatpush.bf16.msra.mxu2 %v951_v26 }
  0x1d   :  { %609 = vmatpush.bf16.msra.mxu3 %v959_v27  ;;  %v998_v27 = vld [vmem:[#allocation2] ss:$0 sm:$0xff] }
  0x1e   :  { %571 = vmatpush.bf16.msra.mxu0 %v934_v30 }
  0x1f   :  { %584 = vmatpush.bf16.msra.mxu1 %v942_v31 }
  0x20   :  { %597 = vmatpush.bf16.msra.mxu2 %v950_v34 }
  0x21   :  { %610 = vmatpush.bf16.msra.mxu3 %v958_v35  ;;  %572 = vmatmul.bf16.vlgmr.msra.gmra.mxu0 %v164_v43 }
  0x22   :  { %616 = vmatpush.bf16.msrb.mxu0 %v973_v38  ;;  %585 = vmatmul.bf16.vlgmr.msra.gmra.mxu1 %v165_v45 }
  0x23   :  { %629 = vmatpush.bf16.msrb.mxu1 %v981_v39  ;;  %598 = vmatmul.bf16.vlgmr.msra.gmra.mxu2 %v166_v42 }
  0x24   :  { %642 = vmatpush.bf16.msrb.mxu2 %v989_v40  ;;  %611 = vmatmul.bf16.vlgmr.msra.gmra.mxu3 %v167_v44 }
  0x25   :  { %655 = vmatpush.bf16.msrb.mxu3 %v997_v41 }
  0x26   :  { %617 = vmatpush.bf16.msrb.mxu0 %v972_v46 }
  0x27   :  { %630 = vmatpush.bf16.msrb.mxu1 %v980_v47 }
  0x28   :  { %643 = vmatpush.bf16.msrb.mxu2 %v988_v49 }
  0x29   :  { %656 = vmatpush.bf16.msrb.mxu3 %v996_v50 }
  0x2a   :  { %618 = vmatpush.bf16.msrb.mxu0 %v971_v51 }
  0x2b   :  { %631 = vmatpush.bf16.msrb.mxu1 %v979_v52 }
  0x2c   :  { %644 = vmatpush.bf16.msrb.mxu2 %v987_v53 }
  0x2d   :  { %657 = vmatpush.bf16.msrb.mxu3 %v995_v54 }
  0x2e   :  { %619 = vmatpush.bf16.msrb.mxu0 %v970_v55 }
  0x2f   :  { %632 = vmatpush.bf16.msrb.mxu1 %v978_v56 }
  0x30   :  { %645 = vmatpush.bf16.msrb.mxu2 %v986_v57 }
  0x31   :  { %658 = vmatpush.bf16.msrb.mxu3 %v994_v58 }
  0x32   :  { %620 = vmatpush.bf16.msrb.mxu0 %v969_v59 }
  0x33   :  { %633 = vmatpush.bf16.msrb.mxu1 %v977_v60 }
  0x34   :  { %646 = vmatpush.bf16.msrb.mxu2 %v985_v61 }
  0x35   :  { %659 = vmatpush.bf16.msrb.mxu3 %v993_v62 }
  0x36   :  { %621 = vmatpush.bf16.msrb.mxu0 %v968_v63 }
  0x37   :  { %634 = vmatpush.bf16.msrb.mxu1 %v976_v0 }
  0x38   :  { %647 = vmatpush.bf16.msrb.mxu2 %v984_v1 }
  0x39   :  { %660 = vmatpush.bf16.msrb.mxu3 %v992_v2 }
  0x3a   :  { %622 = vmatpush.bf16.msrb.mxu0 %v967_v3 }
  0x3b   :  { %635 = vmatpush.bf16.msrb.mxu1 %v975_v4 }
  0x3c   :  { %648 = vmatpush.bf16.msrb.mxu2 %v983_v6 }
  0x3d   :  { %661 = vmatpush.bf16.msrb.mxu3 %v991_v7 }
  0x3e   :  { %623 = vmatpush.bf16.msrb.mxu0 %v966_v11 }
  0x3f   :  { %636 = vmatpush.bf16.msrb.mxu1 %v974_v12 }
  0x40   :  { %649 = vmatpush.bf16.msrb.mxu2 %v982_v15 }
  0x41   :  { %662 = vmatpush.bf16.msrb.mxu3 %v990_v16  ;;  %624 = vmatmul.bf16.vlgmr.msrb.gmra.mxu0 %v168_v17 }
  0x42   :  { %637 = vmatmul.bf16.vlgmr.msrb.gmra.mxu1 %v169_v18 }
  0x43   :  { %650 = vmatmul.bf16.vlgmr.msrb.gmra.mxu2 %v170_v19 }
  0x44   :  { %663 = vmatmul.bf16.vlgmr.msrb.gmra.mxu3 %v171_v20 }
  0x9e   :  { %v573_v21 = vpop.f32.mrf.mxu0 }
  0x9f   :  { %v586_v22 = vpop.f32.mrf.mxu1  ;;  %v574_v30 = vadd.f32 %v998_v27, %v573_v21 }
  0xa1   :  { %v587_v31 = vadd.f32 %v586_v22, %v574_v30 }
  0xa6   :  { %v599_v23 = vpop.f32.mrf.mxu2  ;;  %v575_v25 = vpop.f32.mrf.mxu0 }
  0xa7   :  { %v612_v24 = vpop.f32.mrf.mxu3  ;;  %v588_v26 = vpop.f32.mrf.mxu1  ;;  %v600_v32 = vadd.f32 %v599_v23, %v587_v31 }
  0xa9   :  { %v613_v33 = vadd.f32 %v612_v24, %v600_v32 }
  0xae   :  { %v601_v28 = vpop.f32.mrf.mxu2 }
  0xaf   :  { %v614_v29 = vpop.f32.mrf.mxu3 }
  0xbe   :  { %v625_v34 = vpop.f32.mrf.mxu0 }
  0xbf   :  { %v638_v35 = vpop.f32.mrf.mxu1  ;;  %v626_v36 = vadd.f32 %v625_v34, %v613_v33 }
  0xc1   :  { %v639_v37 = vadd.f32 %v638_v35, %v626_v36 }
  0xc6   :  { %v651_v38 = vpop.f32.mrf.mxu2  ;;  %v627_v41 = vpop.f32.mrf.mxu0 }
  0xc7   :  { %v664_v39 = vpop.f32.mrf.mxu3  ;;  %v652_v40 = vadd.f32 %v651_v38, %v639_v37  ;;  %v640_v42 = vpop.f32.mrf.mxu1 }
  0xc9   :  { %v665_v43 = vadd.f32 %v664_v39, %v652_v40 }
  0xcb   :  { %v668_v44 = vmul.f32 0.5, %v665_v43 }
  0xcd   :  { %999 = vtanh.f32 %v668_v44 }
  0xce   :  { %v653_v45 = vpop.f32.mrf.mxu2 }
  0xcf   :  { %v666_v46 = vpop.f32.mrf.mxu3 }
  0xd3   :  { %v1000_v47 = vpop.eup %999 }
  0xd4   :  { %v670_v48 = vadd.f32 1.0, %v1000_v47 }
  0xd6   :  { %v671_v49 = vmul.f32 0.5, %v670_v48 }
  0xd8   :  { %673 = vst.msk [vmem:[%s1234_s3] sm:$0xff] %vm672_vm0, %v671_v49 }

</bundles_post_ra>
